<compile_context>
chip_gen: v7x
topology: tpu7x:2x2x1
jax: 0.10.0
libtpu: 0.0.40
codegen_flags: <defaults>
</compile_context>

<pallas_src>
import jax
import jax.numpy as jnp
from jax import lax
from jax.experimental import pallas as pl
from jax.experimental.pallas import tpu as pltpu

# ----------------------------- module configuration -----------------------------
B = 2                         # batch
N = 64                        # number of input points
D_IN = 6                      # in_channel (per-point feature dim of `points`)
NPOINT = 16                   # S = number of FPS centroids
RADIUS_LIST = (0.25, 0.5)
NSAMPLE_LIST = (8, 16)        # K per scale
MLP_LIST = ((32, 64), (32, 64))
BN_EPS = 1e-5

C_IN = D_IN + 3                                   # grouped channels: features + rel-xyz
AUG = C_IN + 1                                    # + ones lane (carries layer-1 bias)
C_OUTS = tuple(m[-1] for m in MLP_LIST)           # (64, 64)
C_TOTAL = sum(C_OUTS)                             # 128 -> lane-dense output
HID = sum(m[0] for m in MLP_LIST)                 # 64 merged hidden channels
HID_AUG = HID + 1                                 # + ones lane (carries layer-2 bias)
G = B * NPOINT                                    # groups (tokens) = 32
SRC = B * N + G                                   # source rows: all points + centroids
R_SCALE = tuple(k * G for k in NSAMPLE_LIST)      # (256, 512) grouped rows per scale
R_TOTAL = sum(R_SCALE)                            # 768


# ------------------------- faithful JAX ports of the glue ------------------------
def square_distance(src, dst):
    d = -2.0 * jnp.einsum('bnc,bmc->bnm', src, dst,
                          precision=lax.Precision.HIGHEST)
    d = d + jnp.sum(src ** 2, axis=-1)[:, :, None]
    d = d + jnp.sum(dst ** 2, axis=-1)[:, None, :]
    return d


def index_points(points, idx):
    # points: (B, N, C); idx: (B, ...) int -> (B, ..., C)
    return jax.vmap(lambda p, i: p[i])(points, idx)


def farthest_point_sample(xyz, npoint, key):
    # torch uses a random initial point; mirrored with a deterministic jax.random draw.
    Bn, Nn, _ = xyz.shape
    centroids0 = jnp.zeros((Bn, npoint), jnp.int32)
    distance0 = jnp.full((Bn, Nn), 1e10, jnp.float32)
    farthest0 = jax.random.randint(key, (Bn,), 0, Nn, dtype=jnp.int32)

    def body(i, state):
        centroids, distance, farthest = state
        centroids = centroids.at[:, i].set(farthest)
        centroid = jnp.take_along_axis(xyz, farthest[:, None, None], axis=1)
        dist = jnp.sum((xyz - centroid) ** 2, axis=-1)
        distance = jnp.minimum(distance, dist)
        farthest = jnp.argmax(distance, axis=-1).astype(jnp.int32)
        return centroids, distance, farthest

    centroids, _, _ = lax.fori_loop(0, npoint, body, (centroids0, distance0, farthest0))
    return centroids


def query_ball_point(radius, nsample, xyz, new_xyz):
    Bn, Nn, _ = xyz.shape
    Sn = new_xyz.shape[1]
    group_idx = jnp.broadcast_to(jnp.arange(Nn, dtype=jnp.int32), (Bn, Sn, Nn))
    sqrdists = square_distance(new_xyz, xyz)
    group_idx = jnp.where(sqrdists > radius ** 2, jnp.int32(Nn), group_idx)
    group_idx = jnp.sort(group_idx, axis=-1)[:, :, :nsample]
    group_first = jnp.broadcast_to(group_idx[:, :, :1], group_idx.shape)
    group_idx = jnp.where(group_idx == Nn, group_first, group_idx)
    return group_idx


# ----------------------------------- parameters -----------------------------------
def make_params(key):
    """Raw Conv2d(1x1) + BatchNorm2d parameters, torch layout (out, in)."""
    params = []
    for i in range(len(MLP_LIST)):
        last = C_IN
        layers = []
        for out_c in MLP_LIST[i]:
            key, kw, kb, kg, kbe, km, kv = jax.random.split(key, 7)
            w = jax.random.normal(kw, (out_c, last), jnp.float32) / jnp.sqrt(float(last))
            b = 0.05 * jax.random.normal(kb, (out_c,), jnp.float32)
            gamma = 1.0 + 0.1 * jax.random.normal(kg, (out_c,), jnp.float32)
            beta = 0.1 * jax.random.normal(kbe, (out_c,), jnp.float32)
            mean = 0.1 * jax.random.normal(km, (out_c,), jnp.float32)
            var = jax.random.uniform(kv, (out_c,), jnp.float32, 0.5, 1.5)
            layers.append((w, b, gamma, beta, mean, var))
            last = out_c
        params.append(layers)
    return params


def fold_combined_weights(raw_params):
    """Fold BN (running stats) into the 1x1 convs and merge BOTH radius scales.

    Returns:
      w1c : (AUG, HID_AUG)  layer-1 weights side by side; bias in row C_IN;
            ones-passthrough in column HID (feeds the layer-2 bias row).
      w2c : (HID_AUG, C_TOTAL) block-diagonal layer-2 weights; biases in row HID.
    """
    def fold(w, b, gamma, beta, mean, var):
        s = gamma * lax.rsqrt(var + BN_EPS)
        return (w * s[:, None]).T, (b - mean) * s + beta      # (in,out), (out,)

    hid_sizes = tuple(m[0] for m in MLP_LIST)
    w1c = jnp.zeros((AUG, HID_AUG), jnp.float32)
    w2c = jnp.zeros((HID_AUG, C_TOTAL), jnp.float32)
    h_off = 0
    o_off = 0
    for i in range(len(MLP_LIST)):
        wa, ba = fold(*raw_params[i][0])
        wb, bb = fold(*raw_params[i][1])
        h0, h1 = h_off, h_off + hid_sizes[i]
        o0, o1 = o_off, o_off + C_OUTS[i]
        w1c = w1c.at[:C_IN, h0:h1].set(wa).at[C_IN, h0:h1].set(ba)
        w2c = w2c.at[h0:h1, o0:o1].set(wb).at[HID, o0:o1].set(bb)
        h_off, o_off = h1, o1
    w1c = w1c.at[C_IN, HID].set(1.0)                          # ones-lane passthrough
    return w1c, w2c


# ------------------------------------ the kernel -----------------------------------
def _tree_max_over_k(h, k):
    """(k*G, C) -> (G, C) max over K neighbours.

    Binary tree fold (log2 K dependent maxima) when K is a power of two, linear fold
    otherwise.  Every slice is a multiple of G=32 sublanes, so no relayouts.
    """
    if k & (k - 1) == 0:
        rows = k * G
        while rows > G:
            half = rows // 2
            h = jnp.maximum(h[:half], h[half:])
            rows = half
        return h
    o = h[:G]
    for i in range(1, k):
        o = jnp.maximum(o, h[i * G:(i + 1) * G])
    return o


def msg_mlp_kernel(a_ref, w1m_ref, w2_ref, out_ref):
    """Fused MSG forward for both radius scales.

    a_ref   : (R_TOTAL, SRC) bf16  gather/centroid-subtract selection matrix
              (+1 at the neighbour's source row, -1 at its centroid row).
    w1m_ref : (SRC, HID_AUG) bf16  [points|xyz|1 ; 0|centroid|0] source table
              pre-multiplied (in glue) by the merged folded layer-1 weight.
    w2_ref  : (HID_AUG, C_TOTAL) bf16 block-diagonal merged folded layer-2 weight.
    out_ref : (G, C_TOTAL) f32; lanes [0,64) = scale 0, lanes [64,128) = scale 1.
    """
    # Layer 1 for both scales (gather + centroid subtract + conv1 + BN1 + bias).
    h = jnp.dot(a_ref[...], w1m_ref[...], preferred_element_type=jnp.float32)
    h = jnp.maximum(h, 0.0)                                        # (R_TOTAL, HID_AUG)
    # Layer 2 for both scales (block-diagonal conv2 + BN2 + bias via ones lane).
    h = jnp.dot(h.astype(jnp.bfloat16), w2_ref[...],
                preferred_element_type=jnp.float32)
    h = jnp.maximum(h, 0.0)                                        # (R_TOTAL, C_TOTAL)
    # Per-scale binary-tree max over K neighbours (sublane-aligned slices only).
    o0 = _tree_max_over_k(h[:R_SCALE[0]], NSAMPLE_LIST[0])         # valid lanes [0,64)
    o1 = _tree_max_over_k(h[R_SCALE[0]:], NSAMPLE_LIST[1])         # valid lanes [64,128)
    # Single unmasked lane-dense store; each maximum's off-scale lane half is
    # cross-scale garbage and is discarded by the lane-iota select.
    lane = lax.broadcasted_iota(jnp.int32, (G, C_TOTAL), 1)
    out_ref[...] = jnp.where(lane < C_OUTS[0], o0, o1)


def _cost_estimate():
    flops = 2 * R_TOTAL * SRC * HID_AUG + 2 * R_TOTAL * HID_AUG * C_TOTAL
    bytes_accessed = (R_TOTAL * SRC + SRC * HID_AUG + HID_AUG * C_TOTAL) * 2 \
        + G * C_TOTAL * 4
    return pl.CostEstimate(flops=flops, transcendentals=0, bytes_accessed=bytes_accessed)


# ------------------------------- module forward (glue) ------------------------------
def _gather_matrix(gidx, k):
    """One-hot gather + centroid-subtract selection matrix for one scale.

    Row r = k_idx*G + (b*S + s): +1 at global point column b*N + gidx[b,s,k_idx],
    -1 at global centroid column B*N + (b*S + s).  Values 0/+1/-1 are exact in bf16.
    """
    col = gidx + (jnp.arange(B, dtype=gidx.dtype) * N)[:, None, None]   # (B,S,K)
    col = jnp.transpose(col, (2, 0, 1)).reshape(k * G)                   # K-major rows
    pts = (col[:, None] == jnp.arange(B * N, dtype=jnp.int32)[None, :]
           ).astype(jnp.bfloat16)                                        # (K*G, B*N)
    cen = jnp.tile(-jnp.eye(G, dtype=jnp.bfloat16), (k, 1))              # (K*G, G) const
    return jnp.concatenate([pts, cen], axis=1)                           # (K*G, SRC)


def pointnet_sa_msg(xyz_bcn, points_bdn, raw_params, fps_key):
    """xyz_bcn: (B,3,N); points_bdn: (B,D_IN,N) -> (new_xyz (B,3,S), feats (B,128,S))."""
    xyz = jnp.transpose(xyz_bcn, (0, 2, 1))                 # (B, N, 3)
    points = jnp.transpose(points_bdn, (0, 2, 1))           # (B, N, D_IN)

    fps_idx = farthest_point_sample(xyz, NPOINT, fps_key)   # (B, S)
    new_xyz = index_points(xyz, fps_idx)                    # (B, S, 3)

    # Selection matrix A for both scales, row-concatenated (scale 0 rows first).
    a_blocks = []
    for i, radius in enumerate(RADIUS_LIST):
        gidx = query_ball_point(radius, NSAMPLE_LIST[i], xyz, new_xyz)   # (B,S,K)
        a_blocks.append(_gather_matrix(gidx, NSAMPLE_LIST[i]))
    a_mat = jnp.concatenate(a_blocks, axis=0)                            # (R_TOTAL, SRC)

    # Source table [points|xyz|1 ; 0|centroid|0] pre-multiplied by the merged folded
    # layer-1 weight -> the kernel needs only two matmuls and three inputs total.
    w1c, w2c = fold_combined_weights(raw_params)
    pt_rows = jnp.concatenate([points.reshape(B * N, D_IN), xyz.reshape(B * N, 3),
                               jnp.ones((B * N, 1), jnp.float32)], axis=1)
    cen_rows = jnp.concatenate([jnp.zeros((G, D_IN), jnp.float32),
                                new_xyz.reshape(G, 3),
                                jnp.zeros((G, 1), jnp.float32)], axis=1)
    m_aug = jnp.concatenate([pt_rows, cen_rows], axis=0)                 # (SRC, AUG)
    w1m = jnp.dot(m_aug, w1c, precision=lax.Precision.HIGHEST).astype(jnp.bfloat16)
    w2c_bf = w2c.astype(jnp.bfloat16)

    vmem = pl.BlockSpec(memory_space=pltpu.MemorySpace.VMEM)
    out = pl.pallas_call(
        msg_mlp_kernel,
        out_shape=jax.ShapeDtypeStruct((G, C_TOTAL), jnp.float32),
        in_specs=[vmem, vmem, vmem],
        out_specs=vmem,
        cost_estimate=_cost_estimate(),
    )(a_mat, w1m, w2c_bf)

    new_points = out.reshape(B, NPOINT, C_TOTAL).transpose(0, 2, 1)      # (B, 128, S)
    return jnp.transpose(new_xyz, (0, 2, 1)), new_points


# -------------------------- pure-JAX reference (torch-literal) ----------------------
def reference_forward(xyz_bcn, points_bdn, raw_params, fps_key):
    xyz = jnp.transpose(xyz_bcn, (0, 2, 1))
    points = jnp.transpose(points_bdn, (0, 2, 1))
    fps_idx = farthest_point_sample(xyz, NPOINT, fps_key)
    new_xyz = index_points(xyz, fps_idx)

    new_points_list = []
    for i, radius in enumerate(RADIUS_LIST):
        K = NSAMPLE_LIST[i]
        gidx = query_ball_point(radius, K, xyz, new_xyz)
        grouped_xyz = index_points(xyz, gidx) - new_xyz[:, :, None, :]
        grouped_points = jnp.concatenate([index_points(points, gidx), grouped_xyz], -1)
        g = jnp.transpose(grouped_points, (0, 3, 2, 1))                   # (B, C, K, S)
        for j in range(len(MLP_LIST[i])):
            w, b, gamma, beta, mean, var = raw_params[i][j]
            g = jnp.einsum('oc,bcks->boks', w, g,
                           precision=lax.Precision.HIGHEST) + b[None, :, None, None]
            scale = (gamma * lax.rsqrt(var + BN_EPS))[None, :, None, None]
            g = (g - mean[None, :, None, None]) * scale + beta[None, :, None, None]
            g = jnp.maximum(g, 0.0)
        new_points_list.append(jnp.max(g, axis=2))                        # (B, C_out, S)

    return jnp.transpose(new_xyz, (0, 2, 1)), jnp.concatenate(new_points_list, axis=1)


# --------------------------------------- main ---------------------------------------
if __name__ == "__main__":
    root = jax.random.PRNGKey(0)
    k_xyz, k_pts, k_par, k_fps = jax.random.split(root, 4)

    xyz = jax.random.uniform(k_xyz, (B, 3, N), jnp.float32)       # positions (B, 3, N)
    points = jax.random.normal(k_pts, (B, D_IN, N), jnp.float32)  # features  (B, D, N)
    params = make_params(k_par)

    run = jax.jit(pointnet_sa_msg)
    new_xyz, new_points = run(xyz, points, params, k_fps)
    new_xyz = jax.block_until_ready(new_xyz)
    new_points = jax.block_until_ready(new_points)
    assert new_xyz.shape == (B, 3, NPOINT)
    assert new_points.shape == (B, C_TOTAL, NPOINT)

    ref_xyz, ref_points = jax.jit(reference_forward)(xyz, points, params, k_fps)
    ref_xyz = jax.block_until_ready(ref_xyz)
    ref_points = jax.block_until_ready(ref_points)

    assert jnp.allclose(new_xyz, ref_xyz, rtol=1e-5, atol=1e-5)
    # bf16 MXU operands (per perf review) put the error floor at ~2^-8 relative over
    # two accumulation layers; 3e-2 is bf16-level and still flags any layout/fold/index
    # bug (those produce O(0.1-1) discrepancies).
    assert jnp.allclose(new_points, ref_points, rtol=3e-2, atol=3e-2), (
        float(jnp.max(jnp.abs(new_points - ref_points))))

    print("KERNEL_OK")
</pallas_src>

<mosaic_0001>
module attributes {stable_mosaic.version = 11 : i64} {
  func.func @msg_mlp_kernel(%arg0: memref<768x160xbf16, #tpu.memory_space<vmem>>, %arg1: memref<160x65xbf16, #tpu.memory_space<vmem>>, %arg2: memref<65x128xbf16, #tpu.memory_space<vmem>>, %arg3: memref<32x128xf32, #tpu.memory_space<vmem>>) attributes {dimension_semantics = [], scalar_prefetch = 0 : i64, scratch_operands = 0 : i64, tpu.core_type = #tpu.core_type<tc>} {
    %c0 = arith.constant 0 : index
    %c0_0 = arith.constant 0 : index
    %0 = vector.load %arg0[%c0, %c0_0] : memref<768x160xbf16, #tpu.memory_space<vmem>>, vector<768x160xbf16>
    %c0_1 = arith.constant 0 : index
    %c0_2 = arith.constant 0 : index
    %1 = vector.load %arg1[%c0_1, %c0_2] : memref<160x65xbf16, #tpu.memory_space<vmem>>, vector<160x65xbf16>
    %cst = arith.constant dense<0.000000e+00> : vector<768x65xf32>
    %2 = tpu.matmul %0, %1, %cst {dimension_numbers = #tpu.dot_dimension_numbers<[1], [0], [0], [1], [0, 0, 1, 1], [], []>} : vector<768x160xbf16>, vector<160x65xbf16>, vector<768x65xf32> -> vector<768x65xf32>
    %cst_3 = arith.constant 0.000000e+00 : f32
    %3 = vector.broadcast %cst_3 : f32 to vector<768x65xf32>
    %4 = arith.maximumf %2, %3 : vector<768x65xf32>
    %5 = arith.truncf %4 : vector<768x65xf32> to vector<768x65xbf16>
    %c0_4 = arith.constant 0 : index
    %c0_5 = arith.constant 0 : index
    %6 = vector.load %arg2[%c0_4, %c0_5] : memref<65x128xbf16, #tpu.memory_space<vmem>>, vector<65x128xbf16>
    %cst_6 = arith.constant dense<0.000000e+00> : vector<768x128xf32>
    %7 = tpu.matmul %5, %6, %cst_6 {dimension_numbers = #tpu.dot_dimension_numbers<[1], [0], [0], [1], [0, 0, 1, 1], [], []>} : vector<768x65xbf16>, vector<65x128xbf16>, vector<768x128xf32> -> vector<768x128xf32>
    %cst_7 = arith.constant 0.000000e+00 : f32
    %8 = vector.broadcast %cst_7 : f32 to vector<768x128xf32>
    %9 = arith.maximumf %7, %8 : vector<768x128xf32>
    %10 = vector.extract_strided_slice %9 {offsets = [0, 0], sizes = [256, 128], strides = [1, 1]} : vector<768x128xf32> to vector<256x128xf32>
    %11 = vector.extract_strided_slice %10 {offsets = [0, 0], sizes = [128, 128], strides = [1, 1]} : vector<256x128xf32> to vector<128x128xf32>
    %12 = vector.extract_strided_slice %10 {offsets = [128, 0], sizes = [128, 128], strides = [1, 1]} : vector<256x128xf32> to vector<128x128xf32>
    %13 = arith.maximumf %11, %12 : vector<128x128xf32>
    %14 = vector.extract_strided_slice %13 {offsets = [0, 0], sizes = [64, 128], strides = [1, 1]} : vector<128x128xf32> to vector<64x128xf32>
    %15 = vector.extract_strided_slice %13 {offsets = [64, 0], sizes = [64, 128], strides = [1, 1]} : vector<128x128xf32> to vector<64x128xf32>
    %16 = arith.maximumf %14, %15 : vector<64x128xf32>
    %17 = vector.extract_strided_slice %16 {offsets = [0, 0], sizes = [32, 128], strides = [1, 1]} : vector<64x128xf32> to vector<32x128xf32>
    %18 = vector.extract_strided_slice %16 {offsets = [32, 0], sizes = [32, 128], strides = [1, 1]} : vector<64x128xf32> to vector<32x128xf32>
    %19 = arith.maximumf %17, %18 : vector<32x128xf32>
    %20 = vector.extract_strided_slice %9 {offsets = [256, 0], sizes = [512, 128], strides = [1, 1]} : vector<768x128xf32> to vector<512x128xf32>
    %21 = vector.extract_strided_slice %20 {offsets = [0, 0], sizes = [256, 128], strides = [1, 1]} : vector<512x128xf32> to vector<256x128xf32>
    %22 = vector.extract_strided_slice %20 {offsets = [256, 0], sizes = [256, 128], strides = [1, 1]} : vector<512x128xf32> to vector<256x128xf32>
    %23 = arith.maximumf %21, %22 : vector<256x128xf32>
    %24 = vector.extract_strided_slice %23 {offsets = [0, 0], sizes = [128, 128], strides = [1, 1]} : vector<256x128xf32> to vector<128x128xf32>
    %25 = vector.extract_strided_slice %23 {offsets = [128, 0], sizes = [128, 128], strides = [1, 1]} : vector<256x128xf32> to vector<128x128xf32>
    %26 = arith.maximumf %24, %25 : vector<128x128xf32>
    %27 = vector.extract_strided_slice %26 {offsets = [0, 0], sizes = [64, 128], strides = [1, 1]} : vector<128x128xf32> to vector<64x128xf32>
    %28 = vector.extract_strided_slice %26 {offsets = [64, 0], sizes = [64, 128], strides = [1, 1]} : vector<128x128xf32> to vector<64x128xf32>
    %29 = arith.maximumf %27, %28 : vector<64x128xf32>
    %30 = vector.extract_strided_slice %29 {offsets = [0, 0], sizes = [32, 128], strides = [1, 1]} : vector<64x128xf32> to vector<32x128xf32>
    %31 = vector.extract_strided_slice %29 {offsets = [32, 0], sizes = [32, 128], strides = [1, 1]} : vector<64x128xf32> to vector<32x128xf32>
    %32 = arith.maximumf %30, %31 : vector<32x128xf32>
    %33 = tpu.iota {dimensions = array<i32: 1>} : vector<32x128xi32>
    %c64_i32 = arith.constant 64 : i32
    %34 = vector.broadcast %c64_i32 : i32 to vector<32x128xi32>
    %35 = arith.cmpi slt, %33, %34 : vector<32x128xi32>
    %36 = arith.select %35, %19, %32 : vector<32x128xi1>, vector<32x128xf32>
    %c0_8 = arith.constant 0 : index
    %c0_9 = arith.constant 0 : index
    %37 = vector.load %arg3[%c0_8, %c0_9] : memref<32x128xf32, #tpu.memory_space<vmem>>, vector<32x128xf32>
    tpu.vector_store %arg3[%c0_8, %c0_9], %36 {strides = array<i32>} : memref<32x128xf32, #tpu.memory_space<vmem>>, vector<32x128xf32>,
    return
  }
}

</mosaic_0001>

<bundles_post_ra>
// kernel: custom-call.4
= control target key start
LH: loop header
LB: loop body
LE: loop exit
PB: predicated region body
PF: predicated region fallthrough
CT: control target
= control target key end

     0   :  { %s6_s0 = inlined_call_operand.vmem [shape: f32[2,64], index: 0, kind: output, shape index: {}]  }

// kernel: eq.26
= control target key start
LH: loop header
LB: loop body
LE: loop exit
PB: predicated region body
PF: predicated region fallthrough
CT: control target
= control target key end

     0   :  { %vm43_vm0 = vcmask 1041409   ;;  %s144_s22 = smov 80   ;;  %vm45_vm1 = vcmask 130048   ;;  %s145_s23 = smov 96   ;;  %vm55_vm2 = vcmask 1048448   ;;  %vm65_vm3 = vcmask 917248   ;;  %s195_s0 = inlined_call_operand.vmem [shape: s32[8,2,16], index: 0, kind: input, shape index: {}]   ;;  %s196_s1 = inlined_call_operand.vmem [shape: s32[256], index: 1, kind: output, shape index: {}]  }
   0x1   :  { %v129_v0 = vld [vmem:[%s195_s0 + $0xe] sm:$0x3]  ;;  %v133_v1 = vld [vmem:[%s195_s0 + $0x6] sm:$0x3]  ;;  %v130_v2 = vld [vmem:[%s195_s0 + $0xc] sm:$0x3] }
   0x2   :  { %8 = vst [vmem:[#allocation1 + $0x38] sm:$0x3] %v129_v0  ;;  %28 = vst [vmem:[#allocation1 + $0x18] sm:$0x3] %v133_v1  ;;  %v134_v3 = vld [vmem:[%s195_s0 + $0x4] sm:$0x3] }
   0x3   :  { %13 = vst [vmem:[#allocation1 + $0x30] sm:$0x3] %v130_v2  ;;  %33 = vst [vmem:[#allocation1 + $0x10] sm:$0x3] %v134_v3  ;;  %v131_v4 = vld [vmem:[%s195_s0 + $0xa] sm:$0x3] }
   0x4   :  { %v135_v5 = vld [vmem:[%s195_s0 + $0x2] sm:$0x3]  ;;  %18 = vst [vmem:[#allocation1 + $0x28] sm:$0x3] %v131_v4  ;;  %v132_v6 = vld [vmem:[%s195_s0 + $0x8] sm:$0x3] }
   0x5   :  { %37 = vst [vmem:[#allocation1 + $0x8] sm:$0x3] %v135_v5  ;;  %v38_v7 = vld [vmem:[%s195_s0] sm:$0x3]  ;;  %23 = vst [vmem:[#allocation1 + $0x20] sm:$0x3] %v132_v6 }
   0x6   :  { %39 = vst [vmem:[#allocation1] sm:$0x3] %v38_v7  ;;  %s143_s0 = smov 112   ;;  %s146_s24 = smov 64   ;;  %vm75_vm4 = vcmask 786048   ;;  %vm85_vm5 = vcmask 654848  }
   0x7   :  { %s147_s25 = smov 48   ;;  %s148_s26 = smov 32   ;;  %vm95_vm6 = vcmask 523648   ;;  %vm105_vm7 = vcmask 392448   ;;  %vm115_vm8 = vcmask 261248  }
   0x8   :  { %s149_s27 = smov 16  }
   0x9   :  { %v48_v8 = vld [vmem:[#allocation1 + $0x19] sm:$0x1]   ;;  %v58_v10 = vld [vmem:[#allocation1 + $0x18] sm:$0x1]  }
   0xa   :  { %v50_v9 = vld [vmem:[#allocation1 + $0x38] sm:$0x2]   ;;  %v68_v12 = vld [vmem:[#allocation1 + $0x11] sm:$0x1]   ;;  %v60_v14 = vld [vmem:[#allocation1 + $0x37] sm:$0x2]  }
   0xb   :  { %v52_v11 = vsel %vm43_vm0, %v50_v9, %v48_v8  ;;  %v70_v13 = vld [vmem:[#allocation1 + $0x30] sm:$0x2]   ;;  %v78_v16 = vld [vmem:[#allocation1 + $0x10] sm:$0x1]   ;;  %v62_v18 = vsel %vm43_vm0, %v60_v14, %v58_v10  ;;  %v90_v21 = vld [vmem:[#allocation1 + $0x28] sm:$0x2]  }
   0xc   :  { %53 = vrot.lane.b32.xlu0 %v52_v11, %s143_s0  ;;  %v72_v15 = vsel %vm43_vm0, %v70_v13, %v68_v12  ;;  %v80_v17 = vld [vmem:[#allocation1 + $0x2f] sm:$0x2]   ;;  %v88_v20 = vld [vmem:[#allocation1 + $0x9] sm:$0x1]   ;;  %v98_v23 = vld [vmem:[#allocation1 + $0x8] sm:$0x1]  }
   0xd   :  { %73 = vrot.lane.b32.xlu1 %v72_v15, %s144_s22  ;;  %v82_v19 = vsel %vm43_vm0, %v80_v17, %v78_v16  ;;  %v40_v22 = vld [vmem:[#allocation1] sm:$0x1]   ;;  %v100_v24 = vld [vmem:[#allocation1 + $0x27] sm:$0x2]   ;;  %v92_v27 = vsel %vm43_vm0, %v90_v21, %v88_v20  ;;  %v108_v29 = vld [vmem:[#allocation1 + $0x1] sm:$0x1]  }
   0xe   :  { %v42_v25 = vld [vmem:[#allocation1 + $0x1f] sm:$0x2]   ;;  %v102_v28 = vsel %vm43_vm0, %v100_v24, %v98_v23  ;;  %v110_v30 = vld [vmem:[#allocation1 + $0x20] sm:$0x2]  }
   0xf   :  { %v44_v26 = vsel %vm43_vm0, %v42_v25, %v40_v22  ;;  %v112_v31 = vsel %vm43_vm0, %v110_v30, %v108_v29 }
  0x10   :  { %63 = vrot.lane.b32.xlu0 %v62_v18, %s145_s23  ;;  %46 = vst.msk [vmem:[#allocation0] sm:$0x3] %vm45_vm1, %v44_v26  }
  0x11   :  { %83 = vrot.lane.b32.xlu1 %v82_v19, %s146_s24 }
  0x14   :  { %93 = vrot.lane.b32.xlu0 %v92_v27, %s147_s25 }
  0x15   :  { %103 = vrot.lane.b32.xlu1 %v102_v28, %s148_s26 }
  0x18   :  { %113 = vrot.lane.b32.xlu0 %v112_v31, %s149_s27 }
  0x7e   :  { %v54_v32 = vpop.permute.xlu0 %53  }
  0x7f   :  { %56 = vst.msk [vmem:[#allocation0] sm:$0x3] %vm55_vm2, %v54_v32   ;;  %v74_v33 = vpop.permute.xlu1 %73  }
  0x82   :  { %v64_v34 = vpop.permute.xlu0 %63  }
  0x83   :  { %66 = vst.msk [vmem:[#allocation0] sm:$0x3] %vm65_vm3, %v64_v34   ;;  %v84_v35 = vpop.permute.xlu1 %83  }
  0x84   :  { %76 = vst.msk [vmem:[#allocation0] sm:$0x3] %vm75_vm4, %v74_v33  }
  0x85   :  { %86 = vst.msk [vmem:[#allocation0] sm:$0x3] %vm85_vm5, %v84_v35  }
  0x86   :  { %v94_v36 = vpop.permute.xlu0 %93  }
  0x87   :  { %96 = vst.msk [vmem:[#allocation0] sm:$0x3] %vm95_vm6, %v94_v36   ;;  %v104_v37 = vpop.permute.xlu1 %103  }
  0x88   :  { %106 = vst.msk [vmem:[#allocation0] sm:$0x3] %vm105_vm7, %v104_v37  }
  0x8a   :  { %v114_v38 = vpop.permute.xlu0 %113  }
  0x8b   :  { %116 = vst.msk [vmem:[#allocation0] sm:$0x3] %vm115_vm8, %v114_v38  }
  0x92   :  { %v120_v39 = vld [vmem:[#allocation0] sm:$0x3] }
  0x93   :  { %122 = vst [vmem:[%s196_s1] sm:$0x3] %v120_v39 }

// kernel: eq.35
= control target key start
LH: loop header
LB: loop body
LE: loop exit
PB: predicated region body
PF: predicated region fallthrough
CT: control target
= control target key end

     0   :  { %vm83_vm0 = vcmask 1041409   ;;  %vm87_vm1 = vcmask 1042434   ;;  %vm91_vm2 = vcmask 1043459   ;;  %s264_s9 = smov 80   ;;  %s265_s10 = smov 96   ;;  %vm93_vm3 = vcmask 130048   ;;  %s355_s0 = inlined_call_operand.vmem [shape: s32[16,2,16], index: 0, kind: input, shape index: {}]   ;;  %s356_s1 = inlined_call_operand.vmem [shape: s32[512], index: 1, kind: output, shape index: {}]  }
   0x1   :  { %v241_v0 = vld [vmem:[%s355_s0 + $0x1e] sm:$0x3]  ;;  %v245_v1 = vld [vmem:[%s355_s0 + $0x16] sm:$0x3]  ;;  %v249_v2 = vld [vmem:[%s355_s0 + $0xe] sm:$0x3] }
   0x2   :  { %8 = vst [vmem:[#allocation1 + $0x78] sm:$0x3] %v241_v0  ;;  %28 = vst [vmem:[#allocation1 + $0x58] sm:$0x3] %v245_v1  ;;  %v253_v3 = vld [vmem:[%s355_s0 + $0x6] sm:$0x3] }
   0x3   :  { %48 = vst [vmem:[#allocation1 + $0x38] sm:$0x3] %v249_v2  ;;  %68 = vst [vmem:[#allocation1 + $0x18] sm:$0x3] %v253_v3  ;;  %v242_v4 = vld [vmem:[%s355_s0 + $0x1c] sm:$0x3] }
   0x4   :  { %v246_v5 = vld [vmem:[%s355_s0 + $0x14] sm:$0x3]  ;;  %v250_v6 = vld [vmem:[%s355_s0 + $0xc] sm:$0x3]  ;;  %13 = vst [vmem:[#allocation1 + $0x70] sm:$0x3] %v242_v4 }
   0x5   :  { %33 = vst [vmem:[#allocation1 + $0x50] sm:$0x3] %v246_v5  ;;  %53 = vst [vmem:[#allocation1 + $0x30] sm:$0x3] %v250_v6  ;;  %v254_v7 = vld [vmem:[%s355_s0 + $0x4] sm:$0x3] }
   0x6   :  { %v243_v8 = vld [vmem:[%s355_s0 + $0x1a] sm:$0x3]  ;;  %73 = vst [vmem:[#allocation1 + $0x10] sm:$0x3] %v254_v7  ;;  %v247_v9 = vld [vmem:[%s355_s0 + $0x12] sm:$0x3] }
   0x7   :  { %18 = vst [vmem:[#allocation1 + $0x68] sm:$0x3] %v243_v8  ;;  %v251_v10 = vld [vmem:[%s355_s0 + $0xa] sm:$0x3]  ;;  %38 = vst [vmem:[#allocation1 + $0x48] sm:$0x3] %v247_v9 }
   0x8   :  { %58 = vst [vmem:[#allocation1 + $0x28] sm:$0x3] %v251_v10  ;;  %v255_v11 = vld [vmem:[%s355_s0 + $0x2] sm:$0x3]  ;;  %v244_v12 = vld [vmem:[%s355_s0 + $0x18] sm:$0x3] }
   0x9   :  { %77 = vst [vmem:[#allocation1 + $0x8] sm:$0x3] %v255_v11  ;;  %23 = vst [vmem:[#allocation1 + $0x60] sm:$0x3] %v244_v12  ;;  %v248_v13 = vld [vmem:[%s355_s0 + $0x10] sm:$0x3] }
   0xa   :  { %v252_v14 = vld [vmem:[%s355_s0 + $0x8] sm:$0x3]  ;;  %v78_v15 = vld [vmem:[%s355_s0] sm:$0x3]  ;;  %43 = vst [vmem:[#allocation1 + $0x40] sm:$0x3] %v248_v13 }
   0xb   :  { %63 = vst [vmem:[#allocation1 + $0x20] sm:$0x3] %v252_v14  ;;  %79 = vst [vmem:[#allocation1] sm:$0x3] %v78_v15  ;;  %v98_v16 = vld [vmem:[#allocation1 + $0x38] sm:$0x2]  }
   0xc   :  { %v102_v17 = vld [vmem:[#allocation1 + $0x57] sm:$0x4]   ;;  %v114_v20 = vld [vmem:[#allocation1 + $0x18] sm:$0x1]   ;;  %v134_v23 = vld [vmem:[#allocation1 + $0x30] sm:$0x2]  }
   0xd   :  { %v106_v18 = vld [vmem:[#allocation1 + $0x76] sm:$0x8]   ;;  %v116_v21 = vld [vmem:[#allocation1 + $0x37] sm:$0x2]   ;;  %v138_v24 = vld [vmem:[#allocation1 + $0x4f] sm:$0x4]  }
   0xe   :  { %v96_v19 = vld [vmem:[#allocation1 + $0x19] sm:$0x1]   ;;  %v142_v25 = vld [vmem:[#allocation1 + $0x6e] sm:$0x8]   ;;  %v118_v26 = vsel %vm83_vm0, %v116_v21, %v114_v20  ;;  %v120_v29 = vld [vmem:[#allocation1 + $0x56] sm:$0x4]  }
   0xf   :  { %v100_v22 = vsel %vm83_vm0, %v98_v16, %v96_v19  ;;  %v132_v28 = vld [vmem:[#allocation1 + $0x11] sm:$0x1]   ;;  %v124_v30 = vld [vmem:[#allocation1 + $0x75] sm:$0x8]   ;;  %v122_v33 = vsel %vm87_vm1, %v120_v29, %v118_v26  ;;  %v150_v34 = vld [vmem:[#allocation1 + $0x10] sm:$0x1]  }
  0x10   :  { %v104_v27 = vsel %vm87_vm1, %v102_v17, %v100_v22  ;;  %v136_v32 = vsel %vm83_vm0, %v134_v23, %v132_v28  ;;  %v152_v35 = vld [vmem:[#allocation1 + $0x2f] sm:$0x2]   ;;  %s263_s0 = smov 112   ;;  %v168_v40 = vld [vmem:[#allocation1 + $0x9] sm:$0x1]   ;;  %v126_v43 = vsel %vm91_vm2, %v124_v30, %v122_v33  ;;  %s266_s11 = smov 64  }
  0x11   :  { %v108_v31 = vsel %vm91_vm2, %v106_v18, %v104_v27  ;;  %v156_v36 = vld [vmem:[#allocation1 + $0x4e] sm:$0x4]   ;;  %v140_v37 = vsel %vm87_vm1, %v138_v24, %v136_v32  ;;  %v154_v38 = vsel %vm83_vm0, %v152_v35, %v150_v34  ;;  %v170_v41 = vld [vmem:[#allocation1 + $0x28] sm:$0x2]   ;;  %v186_v47 = vld [vmem:[#allocation1 + $0x8] sm:$0x1]  }
  0x12   :  { %109 = vrot.lane.b32.xlu0 %v108_v31, %s263_s0  ;;  %v160_v39 = vld [vmem:[#allocation1 + $0x6d] sm:$0x8]   ;;  %v144_v42 = vsel %vm91_vm2, %v142_v25, %v140_v37  ;;  %v158_v44 = vsel %vm87_vm1, %v156_v36, %v154_v38  ;;  %v172_v45 = vsel %vm83_vm0, %v170_v41, %v168_v40  ;;  %v174_v46 = vld [vmem:[#allocation1 + $0x47] sm:$0x4]   ;;  %v188_v50 = vld [vmem:[#allocation1 + $0x27] sm:$0x2]  }
  0x13   :  { %145 = vrot.lane.b32.xlu1 %v144_v42, %s264_s9  ;;  %v176_v48 = vsel %vm87_vm1, %v174_v46, %v172_v45  ;;  %v178_v49 = vld [vmem:[#allocation1 + $0x66] sm:$0x8]   ;;  %v192_v51 = vld [vmem:[#allocation1 + $0x46] sm:$0x4]   ;;  %v162_v52 = vsel %vm91_vm2, %v160_v39, %v158_v44  ;;  %v190_v53 = vsel %vm83_vm0, %v188_v50, %v186_v47  ;;  %v204_v54 = vld [vmem:[#allocation1 + $0x1] sm:$0x1]  }
  0x14   :  { %v206_v55 = vld [vmem:[#allocation1 + $0x20] sm:$0x2]   ;;  %v194_v57 = vsel %vm87_vm1, %v192_v51, %v190_v53  ;;  %v196_v58 = vld [vmem:[#allocation1 + $0x65] sm:$0x8]   ;;  %v80_v60 = vld [vmem:[#allocation1] sm:$0x1]   ;;  %v180_v62 = vsel %vm91_vm2, %v178_v49, %v176_v48 }
  0x15   :  { %v210_v56 = vld [vmem:[#allocation1 + $0x3f] sm:$0x4]   ;;  %v208_v59 = vsel %vm83_vm0, %v206_v55, %v204_v54  ;;  %v82_v61 = vld [vmem:[#allocation1 + $0x1f] sm:$0x2]   ;;  %v198_v5 = vsel %vm91_vm2, %v196_v58, %v194_v57  ;;  %s267_s12 = smov 48   ;;  %s268_s13 = smov 32  }
  0x16   :  { %127 = vrot.lane.b32.xlu0 %v126_v43, %s265_s10  ;;  %v84_v63 = vsel %vm83_vm0, %v82_v61, %v80_v60  ;;  %v86_v0 = vld [vmem:[#allocation1 + $0x3e] sm:$0x4]   ;;  %v212_v2 = vsel %vm87_vm1, %v210_v56, %v208_v59  ;;  %v214_v3 = vld [vmem:[#allocation1 + $0x5e] sm:$0x8]   ;;  %s269_s14 = smov 16   ;;  %vm111_vm4 = vcmask 1048448  }
  0x17   :  { %v90_v1 = vld [vmem:[#allocation1 + $0x5d] sm:$0x8]   ;;  %163 = vrot.lane.b32.xlu1 %v162_v52, %s266_s11  ;;  %v88_v4 = vsel %vm87_vm1, %v86_v0, %v84_v63  ;;  %v216_v7 = vsel %vm91_vm2, %v214_v3, %v212_v2  ;;  %vm129_vm5 = vcmask 917248   ;;  %vm147_vm6 = vcmask 786048  }
  0x18   :  { %v92_v6 = vsel %vm91_vm2, %v90_v1, %v88_v4  ;;  %vm165_vm7 = vcmask 654848   ;;  %vm183_vm8 = vcmask 523648   ;;  %vm201_vm9 = vcmask 392448  }
  0x19   :  { %94 = vst.msk [vmem:[#allocation0] sm:$0xf] %vm93_vm3, %v92_v6   ;;  %vm219_vm10 = vcmask 261248  }
  0x1a   :  { %181 = vrot.lane.b32.xlu0 %v180_v62, %s267_s12 }
  0x1b   :  { %199 = vrot.lane.b32.xlu1 %v198_v5, %s268_s13 }
  0x1e   :  { %217 = vrot.lane.b32.xlu0 %v216_v7, %s269_s14 }
  0x84   :  { %v110_v8 = vpop.permute.xlu0 %109  }
  0x85   :  { %112 = vst.msk [vmem:[#allocation0] sm:$0xf] %vm111_vm4, %v110_v8   ;;  %v146_v9 = vpop.permute.xlu1 %145  }
  0x88   :  { %v128_v10 = vpop.permute.xlu0 %127  }
  0x89   :  { %130 = vst.msk [vmem:[#allocation0] sm:$0xf] %vm129_vm5, %v128_v10   ;;  %v164_v11 = vpop.permute.xlu1 %163  }
  0x8a   :  { %148 = vst.msk [vmem:[#allocation0] sm:$0xf] %vm147_vm6, %v146_v9  }
  0x8b   :  { %166 = vst.msk [vmem:[#allocation0] sm:$0xf] %vm165_vm7, %v164_v11  }
  0x8c   :  { %v182_v12 = vpop.permute.xlu0 %181  }
  0x8d   :  { %184 = vst.msk [vmem:[#allocation0] sm:$0xf] %vm183_vm8, %v182_v12   ;;  %v200_v13 = vpop.permute.xlu1 %199  }
  0x8e   :  { %202 = vst.msk [vmem:[#allocation0] sm:$0xf] %vm201_vm9, %v200_v13  }
  0x90   :  { %v218_v14 = vpop.permute.xlu0 %217  }
  0x91   :  { %220 = vst.msk [vmem:[#allocation0] sm:$0xf] %vm219_vm10, %v218_v14  }
  0x98   :  { %v224_v15 = vld [vmem:[#allocation0] sm:$0xf] }
  0x99   :  { %226 = vst [vmem:[%s356_s1] sm:$0xf] %v224_v15 }

// kernel: pointnet_sa_msg.1
= control target key start
LH: loop header
LB: loop body
LE: loop exit
PB: predicated region body
PF: predicated region fallthrough
CT: control target
= control target key end

     0   :  { %v2718_v1 = vmov 0   ;;  %vm624_vm0 = vcmask 261120   ;;  %s3352_s0 = inlined_call_operand.vmem [shape: bf16[768,160], index: 0, kind: input, shape index: {}]   ;;  %s3353_s1 = inlined_call_operand.vmem [shape: bf16[160,65], index: 1, kind: input, shape index: {}]   ;;  %s3354_s2 = inlined_call_operand.vmem [shape: bf16[65,128], index: 2, kind: input, shape index: {}]   ;;  %s3355_s3 = inlined_call_operand.hbm [shape: f32[32,128], index: 3, kind: output, shape index: {}]  }
   0x1   :  { %v2535_v0 = vld [vmem:[%s3353_s1] sm:$0xff]   ;;  %769 = vmatprep.subr.bf16.mxu0 %v2718_v1  ;;  %2511 = vmatprep.subr.bf16.mxu1 %v2718_v1  ;;  %v2536_v2 = vld [vmem:[%s3353_s1 + $0x8] sm:$0xff]   ;;  %v2537_v3 = vld [vmem:[%s3353_s1 + $0x10] sm:$0xff]  }
   0x2   :  { %770 = vmatpush1.bf16.msra.mxu0 %v2535_v0  ;;  %2521 = vmatpush1.bf16.msra.mxu1 %v2535_v0  ;;  %v2538_v4 = vld [vmem:[%s3353_s1 + $0x18] sm:$0xff]   ;;  %v2547_v5 = vld [vmem:[%s3352_s0 + $0x4] ss:$8 sps:$4 sm:$0xff]   ;;  %v2541_v8 = vld [vmem:[%s3353_s1 + $0x30] sm:$0xff]  }
   0x3   :  { %771 = vmatprep.subr.bf16.mxu0 %v2718_v1  ;;  %2512 = vmatprep.subr.bf16.mxu1 %v2718_v1  ;;  %v2539_v6 = vld [vmem:[%s3353_s1 + $0x20] sm:$0xff]   ;;  %v2540_v7 = vld [vmem:[%s3353_s1 + $0x28] sm:$0xff]   ;;  %v2542_v9 = vld [vmem:[%s3353_s1 + $0x38] sm:$0xff]  }
   0x4   :  { %2251 = vmatprep.mubr.msk.bf16.mxu0 %vm624_vm0, %v2547_v5  ;;  %v2543_v10 = vld [vmem:[%s3353_s1 + $0x40] sm:$0xff]   ;;  %v2544_v11 = vld [vmem:[%s3353_s1 + $0x48] sm:$0xff]   ;;  %v2548_v13 = vld [vmem:[%s3352_s0 + $0x14] ss:$8 sps:$4 sm:$0xff]  }
   0x5   :  { %v2545_v12 = vld [vmem:[%s3352_s0] ss:$8 sps:$4 sm:$0xff]   ;;  %v2598_v14 = vld [vmem:[%s3352_s0 + $0x244] ss:$8 sps:$4 sm:$0xff]   ;;  %v2550_v16 = vld [vmem:[%s3352_s0 + $0x10] ss:$8 sps:$4 sm:$0xff]  }
   0x6   :  { %772 = vmatpush1.bf16.msra.mxu0 %v2536_v2  ;;  %2522 = vmatpush1.bf16.msra.mxu1 %v2536_v2  ;;  %v2596_v15 = vld [vmem:[%s3352_s0 + $0x240] ss:$8 sps:$4 sm:$0xff]   ;;  %v2551_v17 = vld [vmem:[%s3352_s0 + $0x24] ss:$8 sps:$4 sm:$0xff]   ;;  %v2602_v18 = vld [vmem:[%s3352_s0 + $0x254] ss:$8 sps:$4 sm:$0xff]  }
   0x7   :  { %773 = vmatprep.subr.bf16.mxu0 %v2718_v1  ;;  %2513 = vmatprep.subr.bf16.mxu1 %v2718_v1  ;;  %v2604_v19 = vld [vmem:[%s3352_s0 + $0x250] ss:$8 sps:$4 sm:$0xff]   ;;  %v2553_v20 = vld [vmem:[%s3352_s0 + $0x20] ss:$8 sps:$4 sm:$0xff]   ;;  %v2554_v21 = vld [vmem:[%s3352_s0 + $0x34] ss:$8 sps:$4 sm:$0xff]  }
   0x8   :  { %2287 = vmatprep.mubr.msk.bf16.mxu1 %vm624_vm0, %v2598_v14  ;;  %v2608_v22 = vld [vmem:[%s3352_s0 + $0x264] ss:$8 sps:$4 sm:$0xff]   ;;  %v2610_v23 = vld [vmem:[%s3352_s0 + $0x260] ss:$8 sps:$4 sm:$0xff]  }
   0xa   :  { %774 = vmatpush1.bf16.msra.mxu0 %v2537_v3  ;;  %2523 = vmatpush1.bf16.msra.mxu1 %v2537_v3 }
   0xb   :  { %775 = vmatprep.subr.bf16.mxu0 %v2718_v1  ;;  %2514 = vmatprep.subr.bf16.mxu1 %v2718_v1 }
   0xe   :  { %776 = vmatpush1.bf16.msra.mxu0 %v2538_v4  ;;  %2524 = vmatpush1.bf16.msra.mxu1 %v2538_v4 }
   0xf   :  { %777 = vmatprep.subr.bf16.mxu0 %v2718_v1  ;;  %2515 = vmatprep.subr.bf16.mxu1 %v2718_v1 }
  0x12   :  { %778 = vmatpush1.bf16.msra.mxu0 %v2539_v6  ;;  %2525 = vmatpush1.bf16.msra.mxu1 %v2539_v6 }
  0x13   :  { %779 = vmatprep.subr.bf16.mxu0 %v2718_v1  ;;  %2516 = vmatprep.subr.bf16.mxu1 %v2718_v1 }
  0x16   :  { %780 = vmatpush1.bf16.msra.mxu0 %v2540_v7  ;;  %2526 = vmatpush1.bf16.msra.mxu1 %v2540_v7 }
  0x17   :  { %781 = vmatprep.subr.bf16.mxu0 %v2718_v1  ;;  %2517 = vmatprep.subr.bf16.mxu1 %v2718_v1 }
  0x1a   :  { %782 = vmatpush1.bf16.msra.mxu0 %v2541_v8  ;;  %2527 = vmatpush1.bf16.msra.mxu1 %v2541_v8 }
  0x1b   :  { %783 = vmatprep.subr.bf16.mxu0 %v2718_v1  ;;  %2518 = vmatprep.subr.bf16.mxu1 %v2718_v1 }
  0x1e   :  { %784 = vmatpush1.bf16.msra.mxu0 %v2542_v9  ;;  %2528 = vmatpush1.bf16.msra.mxu1 %v2542_v9 }
  0x1f   :  { %785 = vmatprep.subr.bf16.mxu0 %v2718_v1  ;;  %2519 = vmatprep.subr.bf16.mxu1 %v2718_v1 }
  0x22   :  { %786 = vmatpush1.bf16.msra.mxu0 %v2543_v10  ;;  %2529 = vmatpush1.bf16.msra.mxu1 %v2543_v10 }
  0x23   :  { %787 = vmatprep.subr.bf16.mxu0 %v2718_v1  ;;  %2520 = vmatprep.subr.bf16.mxu1 %v2718_v1 }
  0x26   :  { %788 = vmatpush1.bf16.msra.mxu0 %v2544_v11  ;;  %2530 = vmatpush1.bf16.msra.mxu1 %v2544_v11 }
  0x29   :  { %802 = vmatmul.mubr.bf16.vlgmr.msra.gmra.mrb[0].mxu0 %v2545_v12  ;;  %1090 = vmatmul.mubr.bf16.vlgmr.msra.gmra.mrb[0].mxu1 %v2596_v15 }
  0x2a   :  { %2252 = vmatprep.mubr.msk.bf16.mxu0 %vm624_vm0, %v2548_v13  ;;  %2288 = vmatprep.mubr.msk.bf16.mxu1 %vm624_vm0, %v2602_v18 }
  0x31   :  { %810 = vmatmul.mubr.bf16.gmra.mrb[4].mxu0 %v2550_v16  ;;  %1098 = vmatmul.mubr.bf16.gmra.mrb[4].mxu1 %v2604_v19 }
  0x32   :  { %2253 = vmatprep.mubr.msk.bf16.mxu0 %vm624_vm0, %v2551_v17  ;;  %2289 = vmatprep.mubr.msk.bf16.mxu1 %vm624_vm0, %v2608_v22 }
  0x39   :  { %818 = vmatmul.mubr.bf16.gmra.mrb[8].mxu0 %v2553_v20  ;;  %1106 = vmatmul.mubr.bf16.gmra.mrb[8].mxu1 %v2610_v23 }
  0x3a   :  { %2254 = vmatprep.mubr.msk.bf16.mxu0 %vm624_vm0, %v2554_v21 }
  0x3b   :  { %8 = vsyncpa [#allocation3], 0  ;;  %v2556_v24 = vld [vmem:[%s3352_s0 + $0x30] ss:$8 sps:$4 sm:$0xff]   ;;  %v2557_v25 = vld [vmem:[%s3352_s0 + $0x44] ss:$8 sps:$4 sm:$0xff]  }
  0x3c   :  { %v2614_v26 = vld [vmem:[%s3352_s0 + $0x274] ss:$8 sps:$4 sm:$0xff]   ;;  %v2616_v27 = vld [vmem:[%s3352_s0 + $0x270] ss:$8 sps:$4 sm:$0xff]   ;;  %v2559_v28 = vld [vmem:[%s3352_s0 + $0x40] ss:$8 sps:$4 sm:$0xff]  }
  0x3d   :  { %2290 = vmatprep.mubr.msk.bf16.mxu1 %vm624_vm0, %v2614_v26  ;;  %v2560_v29 = vld [vmem:[%s3352_s0 + $0x54] ss:$8 sps:$4 sm:$0xff]   ;;  %v2620_v30 = vld [vmem:[%s3352_s0 + $0x284] ss:$8 sps:$4 sm:$0xff]   ;;  %v2622_v31 = vld [vmem:[%s3352_s0 + $0x280] ss:$8 sps:$4 sm:$0xff]  }
  0x3e   :  { %v2562_v32 = vld [vmem:[%s3352_s0 + $0x50] ss:$8 sps:$4 sm:$0xff]   ;;  %v2563_v33 = vld [vmem:[%s3352_s0 + $0x64] ss:$8 sps:$4 sm:$0xff]   ;;  %v2626_v34 = vld [vmem:[%s3352_s0 + $0x294] ss:$8 sps:$4 sm:$0xff]  }
  0x3f   :  { %v2628_v35 = vld [vmem:[%s3352_s0 + $0x290] ss:$8 sps:$4 sm:$0xff]   ;;  %v2565_v36 = vld [vmem:[%s3352_s0 + $0x60] ss:$8 sps:$4 sm:$0xff]   ;;  %v2566_v37 = vld [vmem:[%s3352_s0 + $0x74] ss:$8 sps:$4 sm:$0xff]  }
  0x40   :  { %v2632_v38 = vld [vmem:[%s3352_s0 + $0x2a4] ss:$8 sps:$4 sm:$0xff]   ;;  %v2634_v39 = vld [vmem:[%s3352_s0 + $0x2a0] ss:$8 sps:$4 sm:$0xff]   ;;  %v2568_v40 = vld [vmem:[%s3352_s0 + $0x70] ss:$8 sps:$4 sm:$0xff]  }
  0x41   :  { %826 = vmatmul.mubr.bf16.gmra.mrb[12].mxu0 %v2556_v24  ;;  %1114 = vmatmul.mubr.bf16.gmra.mrb[12].mxu1 %v2616_v27  ;;  %v2569_v41 = vld [vmem:[%s3352_s0 + $0x84] ss:$8 sps:$4 sm:$0xff]   ;;  %v2638_v42 = vld [vmem:[%s3352_s0 + $0x2b4] ss:$8 sps:$4 sm:$0xff]   ;;  %v2640_v43 = vld [vmem:[%s3352_s0 + $0x2b0] ss:$8 sps:$4 sm:$0xff]  }
  0x42   :  { %2255 = vmatprep.mubr.msk.bf16.mxu0 %vm624_vm0, %v2557_v25  ;;  %2291 = vmatprep.mubr.msk.bf16.mxu1 %vm624_vm0, %v2620_v30  ;;  %v2571_v44 = vld [vmem:[%s3352_s0 + $0x80] ss:$8 sps:$4 sm:$0xff]   ;;  %v2572_v45 = vld [vmem:[%s3352_s0 + $0x94] ss:$8 sps:$4 sm:$0xff]   ;;  %v2644_v46 = vld [vmem:[%s3352_s0 + $0x2c4] ss:$8 sps:$4 sm:$0xff]  }
  0x43   :  { %v2646_v47 = vld [vmem:[%s3352_s0 + $0x2c0] ss:$8 sps:$4 sm:$0xff]   ;;  %v2574_v48 = vld [vmem:[%s3352_s0 + $0x90] ss:$8 sps:$4 sm:$0xff]   ;;  %v2575_v49 = vld [vmem:[%s3352_s0 + $0xa4] ss:$8 sps:$4 sm:$0xff]  }
  0x44   :  { %v2650_v50 = vld [vmem:[%s3352_s0 + $0x2d4] ss:$8 sps:$4 sm:$0xff]   ;;  %v2652_v51 = vld [vmem:[%s3352_s0 + $0x2d0] ss:$8 sps:$4 sm:$0xff]   ;;  %v2653_v52 = vld [vmem:[%s3354_s2] sm:$0xff]   ;;  %vm1511_vm1 = vcmask 1040384  }
  0x45   :  { %2405 = vmatprep.subr.bf16.mxu1 %v2653_v52  ;;  %v2577_v53 = vld [vmem:[%s3352_s0 + $0xa0] ss:$8 sps:$4 sm:$0xff]   ;;  %v2578_v54 = vld [vmem:[%s3352_s0 + $0xb4] ss:$8 sps:$4 sm:$0xff]   ;;  %v2657_v55 = vld [vmem:[%s3352_s0 + $0x2e4] ss:$8 sps:$4 sm:$0xff]  }
  0x46   :  { %2406 = vmatpush3.bf16.msra.mxu1 %v2653_v52  ;;  %v2659_v56 = vld [vmem:[%s3352_s0 + $0x2e0] ss:$8 sps:$4 sm:$0xff]   ;;  %v2580_v58 = vld [vmem:[%s3352_s0 + $0xb0] ss:$8 sps:$4 sm:$0xff]   ;;  %v2581_v60 = vld [vmem:[%s3352_s0 + $0xc4] ss:$8 sps:$4 sm:$0xff]  }
  0x47   :  { %v2660_v57 = vld [vmem:[%s3354_s2 + $0x8] sm:$0xff]   ;;  %v2661_v59 = vld [vmem:[%s3354_s2 + $0x10] sm:$0xff]   ;;  %v2668_v63 = vld [vmem:[%s3354_s2 + $0x18] sm:$0xff]   ;;  %v1513_v2 = vsel %vm1511_vm1, 65535, %v2718_v1  ;;  %vm1366_vm2 = vcmask 531456  }
  0x48   :  { %2407 = vmatprep.subr.bf16.mxu1 %v2660_v57  ;;  %v2665_v61 = vld [vmem:[%s3352_s0 + $0x2f4] ss:$8 sps:$4 sm:$0xff]   ;;  %v2667_v62 = vld [vmem:[%s3352_s0 + $0x2f0] ss:$8 sps:$4 sm:$0xff]   ;;  %v2583_v3 = vld [vmem:[%s3352_s0 + $0xc0] ss:$8 sps:$4 sm:$0xff]  }
  0x49   :  { %834 = vmatmul.mubr.bf16.gmra.mrb[16].mxu0 %v2559_v28  ;;  %1122 = vmatmul.mubr.bf16.gmra.mrb[16].mxu1 %v2622_v31  ;;  %v2669_v0 = vld [vmem:[%s3354_s2 + $0x20] ss:$0 sps:$4 sm:$0x11]   ;;  %v2584_v5 = vld [vmem:[%s3352_s0 + $0xd4] ss:$8 sps:$4 sm:$0xff]  }
  0x4a   :  { %2256 = vmatprep.mubr.msk.bf16.mxu0 %vm624_vm0, %v2560_v29  ;;  %2292 = vmatprep.mubr.msk.bf16.mxu1 %vm624_vm0, %v2626_v34  ;;  %v1515_v4 = vand.u32 %v2669_v0, %v1513_v2  ;;  %v2586_v6 = vld [vmem:[%s3352_s0 + $0xd0] ss:$8 sps:$4 sm:$0xff]   ;;  %v2587_v1 = vld [vmem:[%s3352_s0 + $0xe4] ss:$8 sps:$4 sm:$0xff]   ;;  %v2589_v7 = vld [vmem:[%s3352_s0 + $0xe0] ss:$8 sps:$4 sm:$0xff]  }
  0x4b   :  { %2408 = vmatpush3.bf16.msra.mxu1 %v2660_v57  ;;  %v2590_v8 = vld [vmem:[%s3352_s0 + $0xf4] ss:$8 sps:$4 sm:$0xff]   ;;  %v2592_v9 = vld [vmem:[%s3352_s0 + $0xf0] ss:$8 sps:$4 sm:$0xff]   ;;  %v2593_v10 = vld [vmem:[%s3352_s0 + $0x104] ss:$8 sps:$4 sm:$0xff]  }
  0x4c   :  { %2409 = vmatprep.subr.bf16.mxu1 %v2661_v59  ;;  %v2595_v11 = vld [vmem:[%s3352_s0 + $0x100] ss:$8 sps:$4 sm:$0xff]   ;;  %v2599_v12 = vld [vmem:[%s3352_s0 + $0x114] ss:$8 sps:$4 sm:$0xff]   ;;  %v2601_v13 = vld [vmem:[%s3352_s0 + $0x110] ss:$8 sps:$4 sm:$0xff]  }
  0x4d   :  { %v2605_v14 = vld [vmem:[%s3352_s0 + $0x124] ss:$8 sps:$4 sm:$0xff]   ;;  %v2607_v15 = vld [vmem:[%s3352_s0 + $0x120] ss:$8 sps:$4 sm:$0xff]   ;;  %v2611_v16 = vld [vmem:[%s3352_s0 + $0x134] ss:$8 sps:$4 sm:$0xff]  }
  0x4e   :  { %v2613_v17 = vld [vmem:[%s3352_s0 + $0x130] ss:$8 sps:$4 sm:$0xff]   ;;  %v2617_v18 = vld [vmem:[%s3352_s0 + $0x144] ss:$8 sps:$4 sm:$0xff]   ;;  %v2619_v19 = vld [vmem:[%s3352_s0 + $0x140] ss:$8 sps:$4 sm:$0xff]  }
  0x4f   :  { %2410 = vmatpush3.bf16.msra.mxu1 %v2661_v59  ;;  %v2623_v20 = vld [vmem:[%s3352_s0 + $0x154] ss:$8 sps:$4 sm:$0xff]   ;;  %v2625_v21 = vld [vmem:[%s3352_s0 + $0x150] ss:$8 sps:$4 sm:$0xff]   ;;  %v2629_v22 = vld [vmem:[%s3352_s0 + $0x164] ss:$8 sps:$4 sm:$0xff]  }
  0x50   :  { %2411 = vmatprep.subr.bf16.mxu1 %v2668_v63  ;;  %v2631_v23 = vld [vmem:[%s3352_s0 + $0x160] ss:$8 sps:$4 sm:$0xff]   ;;  %v2635_v24 = vld [vmem:[%s3352_s0 + $0x174] ss:$8 sps:$4 sm:$0xff]   ;;  %v2637_v25 = vld [vmem:[%s3352_s0 + $0x170] ss:$8 sps:$4 sm:$0xff]  }
  0x51   :  { %842 = vmatmul.mubr.bf16.gmra.mrb[20].mxu0 %v2562_v32  ;;  %1130 = vmatmul.mubr.bf16.gmra.mrb[20].mxu1 %v2628_v35  ;;  %v2641_v26 = vld [vmem:[%s3352_s0 + $0x184] ss:$8 sps:$4 sm:$0xff]   ;;  %v2643_v27 = vld [vmem:[%s3352_s0 + $0x180] ss:$8 sps:$4 sm:$0xff]   ;;  %v2647_v28 = vld [vmem:[%s3352_s0 + $0x194] ss:$8 sps:$4 sm:$0xff]  }
  0x52   :  { %2257 = vmatprep.mubr.msk.bf16.mxu0 %vm624_vm0, %v2563_v33  ;;  %2293 = vmatprep.mubr.msk.bf16.mxu1 %vm624_vm0, %v2632_v38  ;;  %v2649_v29 = vld [vmem:[%s3352_s0 + $0x190] ss:$8 sps:$4 sm:$0xff]   ;;  %v2654_v30 = vld [vmem:[%s3352_s0 + $0x1a4] ss:$8 sps:$4 sm:$0xff]   ;;  %v2656_v31 = vld [vmem:[%s3352_s0 + $0x1a0] ss:$8 sps:$4 sm:$0xff]  }
  0x53   :  { %2412 = vmatpush3.bf16.msra.mxu1 %v2668_v63  ;;  %v2662_v32 = vld [vmem:[%s3352_s0 + $0x1b4] ss:$8 sps:$4 sm:$0xff]   ;;  %v2664_v35 = vld [vmem:[%s3352_s0 + $0x1b0] ss:$8 sps:$4 sm:$0xff]  }
  0x54   :  { %2413 = vmatprep.subr.bf16.mxu1 %v1515_v4  ;;  %v2679_v0 = vld [vmem:[%s3352_s0 + $0x1f4] ss:$8 sps:$4 sm:$0xff]  }
  0x57   :  { %2414 = vmatpush3.bf16.msra.mxu1 %v1515_v4 }
  0x59   :  { %850 = vmatmul.mubr.bf16.gmra.mrb[24].mxu0 %v2565_v36  ;;  %1138 = vmatmul.mubr.bf16.gmra.mrb[24].mxu1 %v2634_v39 }
  0x5a   :  { %2258 = vmatprep.mubr.msk.bf16.mxu0 %vm624_vm0, %v2566_v37  ;;  %2294 = vmatprep.mubr.msk.bf16.mxu1 %vm624_vm0, %v2638_v42  ;;  %v2670_v37 = vld [vmem:[%s3352_s0 + $0x1c4] ss:$8 sps:$4 sm:$0xff]  }
  0x61   :  { %858 = vmatmul.mubr.bf16.gmra.mrb[28].mxu0 %v2568_v40  ;;  %1146 = vmatmul.mubr.bf16.gmra.mrb[28].mxu1 %v2640_v43 }
  0x62   :  { %2259 = vmatprep.mubr.msk.bf16.mxu0 %vm624_vm0, %v2569_v41  ;;  %2295 = vmatprep.mubr.msk.bf16.mxu1 %vm624_vm0, %v2644_v46  ;;  %v2673_v46 = vld [vmem:[%s3352_s0 + $0x1d4] ss:$8 sps:$4 sm:$0xff]  }
  0x69   :  { %866 = vmatmul.mubr.bf16.gmra.mrb[32].mxu0 %v2571_v44  ;;  %1154 = vmatmul.mubr.bf16.gmra.mrb[32].mxu1 %v2646_v47  ;;  %v2672_v44 = vld [vmem:[%s3352_s0 + $0x1c0] ss:$8 sps:$4 sm:$0xff]  }
  0x6a   :  { %2260 = vmatprep.mubr.msk.bf16.mxu0 %vm624_vm0, %v2572_v45  ;;  %2296 = vmatprep.mubr.msk.bf16.mxu1 %vm624_vm0, %v2650_v50 }
  0x71   :  { %874 = vmatmul.mubr.bf16.gmra.mrb[36].mxu0 %v2574_v48  ;;  %1162 = vmatmul.mubr.bf16.gmra.mrb[36].mxu1 %v2652_v51 }
  0x72   :  { %2261 = vmatprep.mubr.msk.bf16.mxu0 %vm624_vm0, %v2575_v49  ;;  %2297 = vmatprep.mubr.msk.bf16.mxu1 %vm624_vm0, %v2657_v55  ;;  %v2676_v55 = vld [vmem:[%s3352_s0 + $0x1e4] ss:$8 sps:$4 sm:$0xff]  }
  0x79   :  { %882 = vmatmul.mubr.bf16.gmra.mrb[40].mxu0 %v2577_v53  ;;  %1170 = vmatmul.mubr.bf16.gmra.mrb[40].mxu1 %v2659_v56  ;;  %v2675_v53 = vld [vmem:[%s3352_s0 + $0x1d0] ss:$8 sps:$4 sm:$0xff]  }
  0x7a   :  { %2262 = vmatprep.mubr.msk.bf16.mxu0 %vm624_vm0, %v2578_v54  ;;  %2298 = vmatprep.mubr.msk.bf16.mxu1 %vm624_vm0, %v2665_v61 }
  0x81   :  { %890 = vmatmul.mubr.bf16.gmra.mrb[44].mxu0 %v2580_v58  ;;  %1178 = vmatmul.mubr.bf16.gmra.mrb[44].mxu1 %v2667_v62  ;;  %v2678_v62 = vld [vmem:[%s3352_s0 + $0x1e0] ss:$8 sps:$4 sm:$0xff]  }
  0x82   :  { %2263 = vmatprep.mubr.msk.bf16.mxu0 %vm624_vm0, %v2581_v60 }
  0x89   :  { %898 = vmatmul.mubr.bf16.gmra.mrb[48].mxu0 %v2583_v3 }
  0x8a   :  { %2264 = vmatprep.mubr.msk.bf16.mxu0 %vm624_vm0, %v2584_v5 }
  0x91   :  { %906 = vmatmul.mubr.bf16.gmra.mrb[52].mxu0 %v2586_v6 }
  0x92   :  { %2265 = vmatprep.mubr.msk.bf16.mxu0 %vm624_vm0, %v2587_v1 }
  0x99   :  { %914 = vmatmul.mubr.bf16.gmra.mrb[56].mxu0 %v2589_v7  ;;  %v2681_v7 = vld [vmem:[%s3352_s0 + $0x1f0] ss:$8 sps:$4 sm:$0xff]  }
  0x9a   :  { %2266 = vmatprep.mubr.msk.bf16.mxu0 %vm624_vm0, %v2590_v8 }
  0xa1   :  { %922 = vmatmul.mubr.bf16.gmra.mrb[60].mxu0 %v2592_v9  ;;  %v2682_v9 = vld [vmem:[%s3352_s0 + $0x204] ss:$8 sps:$4 sm:$0xff]  }
  0xa2   :  { %2267 = vmatprep.mubr.msk.bf16.mxu0 %vm624_vm0, %v2593_v10 }
  0xa9   :  { %930 = vmatmul.mubr.bf16.gmra.mrb[64].mxu0 %v2595_v11 }
  0xaa   :  { %2268 = vmatprep.mubr.msk.bf16.mxu0 %vm624_vm0, %v2599_v12 }
  0xb1   :  { %938 = vmatmul.mubr.bf16.gmra.mrb[68].mxu0 %v2601_v13 }
  0xb2   :  { %2269 = vmatprep.mubr.msk.bf16.mxu0 %vm624_vm0, %v2605_v14 }
  0xb9   :  { %946 = vmatmul.mubr.bf16.gmra.mrb[72].mxu0 %v2607_v15 }
  0xba   :  { %2270 = vmatprep.mubr.msk.bf16.mxu0 %vm624_vm0, %v2611_v16  ;;  %v2684_v16 = vld [vmem:[%s3352_s0 + $0x200] ss:$8 sps:$4 sm:$0xff]  }
  0xc1   :  { %954 = vmatmul.mubr.bf16.gmra.mrb[76].mxu0 %v2613_v17 }
  0xc2   :  { %2271 = vmatprep.mubr.msk.bf16.mxu0 %vm624_vm0, %v2617_v18  ;;  %v2685_v18 = vld [vmem:[%s3352_s0 + $0x214] ss:$8 sps:$4 sm:$0xff]  }
  0xc9   :  { %962 = vmatmul.mubr.bf16.gmra.mrb[80].mxu0 %v2619_v19 }
  0xca   :  { %2272 = vmatprep.mubr.msk.bf16.mxu0 %vm624_vm0, %v2623_v20 }
  0xd1   :  { %970 = vmatmul.mubr.bf16.gmra.mrb[84].mxu0 %v2625_v21 }
  0xd2   :  { %2273 = vmatprep.mubr.msk.bf16.mxu0 %vm624_vm0, %v2629_v22 }
  0xd9   :  { %978 = vmatmul.mubr.bf16.gmra.mrb[88].mxu0 %v2631_v23 }
  0xda   :  { %2274 = vmatprep.mubr.msk.bf16.mxu0 %vm624_vm0, %v2635_v24 }
  0xe1   :  { %986 = vmatmul.mubr.bf16.gmra.mrb[92].mxu0 %v2637_v25  ;;  %v2687_v25 = vld [vmem:[%s3352_s0 + $0x210] ss:$8 sps:$4 sm:$0xff]  }
  0xe2   :  { %2275 = vmatprep.mubr.msk.bf16.mxu0 %vm624_vm0, %v2641_v26 }
  0xe9   :  { %994 = vmatmul.mubr.bf16.gmra.mrb[96].mxu0 %v2643_v27  ;;  %v2688_v27 = vld [vmem:[%s3352_s0 + $0x224] ss:$8 sps:$4 sm:$0xff]  }
  0xea   :  { %2276 = vmatprep.mubr.msk.bf16.mxu0 %vm624_vm0, %v2647_v28 }
  0xf1   :  { %1002 = vmatmul.mubr.bf16.gmra.mrb[100].mxu0 %v2649_v29 }
  0xf2   :  { %2277 = vmatprep.mubr.msk.bf16.mxu0 %vm624_vm0, %v2654_v30 }
  0xf9   :  { %1010 = vmatmul.mubr.bf16.gmra.mrb[104].mxu0 %v2656_v31 }
  0xfa   :  { %2278 = vmatprep.mubr.msk.bf16.mxu0 %vm624_vm0, %v2662_v32 }
  0xfc   :  { %v803_v33 = vpop.f32.mrb[0].mxu0  ;;  %v1091_v28 = vpop.f32.mrb[0].mxu1 }
  0xfd   :  { %v805_v34 = vpop.f32.mrb[1].mxu0  ;;  %v1186_v38 = vmax.f32 %v803_v33, 0.0  ;;  %v1093_v32 = vpop.f32.mrb[1].mxu1 }
  0xfe   :  { %v806_v36 = vpop.f32.mrb[2].mxu0  ;;  %v1094_v33 = vpop.f32.mrb[2].mxu1 }
  0xff   :  { %v1187_v39 = vmax.f32 %v806_v36, 0.0  ;;  %v808_v40 = vpop.f32.mrb[3].mxu0  ;;  %v1259_v36 = vmax.f32 %v1094_v33, 0.0 }
 0x101   :  { %v1282_v41 = vpack.c.bf16 %v1187_v39, %v1186_v38  ;;  %1018 = vmatmul.mubr.bf16.gmra.mrb[108].mxu0 %v2664_v35  ;;  %v1258_v35 = vmax.f32 %v1091_v28, 0.0 }
 0x102   :  { %2279 = vmatprep.mubr.msk.bf16.mxu0 %vm624_vm0, %v2670_v37  ;;  %v1096_v37 = vpop.f32.mrb[3].mxu1 }
 0x103   :  { %2415 = vmatprep.mubr.msk.bf16.mxu1 %vm1366_vm2, %v1282_v41  ;;  %v3141_v39 = vpack.c.bf16 %v1259_v36, %v1258_v35 }
 0x104   :  { %v811_v42 = vpop.f32.mrb[4].mxu0  ;;  %v1099_v38 = vpop.f32.mrb[4].mxu1 }
 0x105   :  { %v813_v43 = vpop.f32.mrb[5].mxu0  ;;  %v1188_v47 = vmax.f32 %v811_v42, 0.0  ;;  %v1260_v40 = vmax.f32 %v1099_v38, 0.0  ;;  %v1101_v41 = vpop.f32.mrb[5].mxu1 }
 0x106   :  { %v814_v45 = vpop.f32.mrb[6].mxu0  ;;  %v1102_v43 = vpop.f32.mrb[6].mxu1 }
 0x107   :  { %v1189_v48 = vmax.f32 %v814_v45, 0.0  ;;  %v816_v49 = vpop.f32.mrb[7].mxu0  ;;  %v2690_v45 = vld [vmem:[%s3352_s0 + $0x220] ss:$8 sps:$4 sm:$0xff]  }
 0x108   :  { %v2691_v49 = vld [vmem:[%s3352_s0 + $0x234] ss:$8 sps:$4 sm:$0xff]  }
 0x109   :  { %v1283_v50 = vpack.c.bf16 %v1189_v48, %v1188_v47  ;;  %1026 = vmatmul.mubr.bf16.gmra.mrb[112].mxu0 %v2672_v44  ;;  %v1104_v47 = vpop.f32.mrb[7].mxu1 }
 0x10a   :  { %2280 = vmatprep.mubr.msk.bf16.mxu0 %vm624_vm0, %v2673_v46  ;;  %v1261_v46 = vmax.f32 %v1102_v43, 0.0 }
 0x10b   :  { %2416 = vmatmul.mubr.msk.bf16.vlgmr.msra.gmra.mrb[48].mxu1 %vm1366_vm2, %v1283_v50 }
 0x10c   :  { %v819_v51 = vpop.f32.mrb[8].mxu0  ;;  %v1107_v50 = vpop.f32.mrb[8].mxu1 }
 0x10d   :  { %v821_v52 = vpop.f32.mrb[9].mxu0  ;;  %v1190_v56 = vmax.f32 %v819_v51, 0.0 }
 0x10e   :  { %v822_v54 = vpop.f32.mrb[10].mxu0 }
 0x10f   :  { %v1191_v57 = vmax.f32 %v822_v54, 0.0  ;;  %v824_v58 = vpop.f32.mrb[11].mxu0  ;;  %v3149_v54 = vpack.c.bf16 %v1261_v46, %v1260_v40 }
 0x110   :  { %v1262_v58 = vmax.f32 %v1107_v50, 0.0 }
 0x111   :  { %v1284_v59 = vpack.c.bf16 %v1191_v57, %v1190_v56  ;;  %1034 = vmatmul.mubr.bf16.gmra.mrb[116].mxu0 %v2675_v53 }
 0x112   :  { %2281 = vmatprep.mubr.msk.bf16.mxu0 %vm624_vm0, %v2676_v55  ;;  %v1109_v55 = vpop.f32.mrb[9].mxu1 }
 0x113   :  { %2419 = vmatprep.mubr.msk.bf16.mxu1 %vm1366_vm2, %v1284_v59  ;;  %v1110_v56 = vpop.f32.mrb[10].mxu1 }
 0x114   :  { %v827_v60 = vpop.f32.mrb[12].mxu0  ;;  %v1263_v59 = vmax.f32 %v1110_v56, 0.0 }
 0x115   :  { %v829_v61 = vpop.f32.mrb[13].mxu0  ;;  %v1192_v2 = vmax.f32 %v827_v60, 0.0  ;;  %v1112_v60 = vpop.f32.mrb[11].mxu1 }
 0x116   :  { %v830_v63 = vpop.f32.mrb[14].mxu0  ;;  %v1115_v61 = vpop.f32.mrb[12].mxu1 }
 0x117   :  { %v1193_v3 = vmax.f32 %v830_v63, 0.0  ;;  %v832_v4 = vpop.f32.mrb[15].mxu0  ;;  %v1264_v63 = vmax.f32 %v1115_v61, 0.0 }
 0x119   :  { %v1285_v5 = vpack.c.bf16 %v1193_v3, %v1192_v2  ;;  %1042 = vmatmul.mubr.bf16.gmra.mrb[120].mxu0 %v2678_v62  ;;  %v3153_v62 = vpack.c.bf16 %v1263_v59, %v1262_v58 }
 0x11a   :  { %2282 = vmatprep.mubr.msk.bf16.mxu0 %vm624_vm0, %v2679_v0  ;;  %v1117_v0 = vpop.f32.mrb[13].mxu1 }
 0x11b   :  { %2420 = vmatmul.mubr.msk.bf16.gmra.mrb[52].mxu1 %vm1366_vm2, %v1285_v5  ;;  %v1118_v3 = vpop.f32.mrb[14].mxu1  ;;  %v2693_v5 = vld [vmem:[%s3352_s0 + $0x230] ss:$8 sps:$4 sm:$0xff]   ;;  %s2719_s0 = smov [#allocation2]  }
 0x11c   :  { %v835_v6 = vpop.f32.mrb[16].mxu0  ;;  %s2134_s7 = sshll.u32 %s2719_s0, 4  ;;  %s2135_s7 = int_to_ptr.vmem [resolvable:$true] %s2134_s7 }
 0x11d   :  { %v837_v1 = vpop.f32.mrb[17].mxu0  ;;  %v1194_v10 = vmax.f32 %v835_v6, 0.0  ;;  %v1265_v6 = vmax.f32 %v1118_v3, 0.0  ;;  %s2694_s8 = scalar_lea.vmem %s2135_s7, 512  ;;  %p2699_p1 = scmp.lt.s32.totalorder %s2135_s7, %s2135_s7 }
 0x11e   :  { %v838_v8 = vpop.f32.mrb[18].mxu0  ;;  %v1120_v1 = vpop.f32.mrb[15].mxu1  ;;  %p2695_p0 = scmp.ne.s32.totalorder %s2135_s7, %s2694_s8  ;;  %p2700_p2 = scmp.lt.s32.totalorder %s2694_s8, %s2694_s8 }
 0x11f   :  { %v1195_v11 = vmax.f32 %v838_v8, 0.0  ;;  %v840_v12 = vpop.f32.mrb[19].mxu0  ;;  %v1123_v8 = vpop.f32.mrb[16].mxu1 }
 0x120   :  { %v3158_v12 = vpack.c.bf16 %v1265_v6, %v1264_v63  ;;  %p2701_p3 = por %p2700_p2, %p2699_p1 }
 0x121   :  { %v1286_v13 = vpack.c.bf16 %v1195_v11, %v1194_v10  ;;  %1050 = vmatmul.mubr.bf16.gmra.mrb[124].mxu0 %v2681_v7 }
 0x122   :  { %2283 = vmatprep.mubr.msk.bf16.mxu0 %vm624_vm0, %v2682_v9  ;;  %p2702_p4 = pnand %p2701_p3, %p2695_p0 }
 0x123   :  { %2423 = vmatprep.mubr.msk.bf16.mxu1 %vm1366_vm2, %v1286_v13  ;;  %v1125_v13 = vpop.f32.mrb[17].mxu1 }
 0x124   :  { %v843_v14 = vpop.f32.mrb[20].mxu0 }
 0x125   :  { %v845_v15 = vpop.f32.mrb[21].mxu0  ;;  %v1196_v19 = vmax.f32 %v843_v14, 0.0  ;;  %v1126_v14 = vpop.f32.mrb[18].mxu1 }
 0x126   :  { %v846_v17 = vpop.f32.mrb[22].mxu0 }
 0x127   :  { %v1197_v20 = vmax.f32 %v846_v17, 0.0  ;;  %v848_v21 = vpop.f32.mrb[23].mxu0  ;;  %v1267_v17 = vmax.f32 %v1126_v14, 0.0 }
 0x129   :  { %v1287_v22 = vpack.c.bf16 %v1197_v20, %v1196_v19  ;;  %1058 = vmatmul.mubr.bf16.gmra.mrb[128].mxu0 %v2684_v16  ;;  %v1266_v16 = vmax.f32 %v1123_v8, 0.0 }
 0x12a   :  { %2284 = vmatprep.mubr.msk.bf16.mxu0 %vm624_vm0, %v2685_v18  ;;  %v1128_v18 = vpop.f32.mrb[19].mxu1 }
 0x12b   :  { %2424 = vmatmul.mubr.msk.bf16.gmra.mrb[56].mxu1 %vm1366_vm2, %v1287_v22  ;;  %v1131_v19 = vpop.f32.mrb[20].mxu1  ;;  %v3161_v20 = vpack.c.bf16 %v1267_v17, %v1266_v16 }
 0x12c   :  { %v851_v23 = vpop.f32.mrb[24].mxu0  ;;  %v1268_v21 = vmax.f32 %v1131_v19, 0.0  ;;  %v1133_v22 = vpop.f32.mrb[21].mxu1 }
 0x12d   :  { %v853_v24 = vpop.f32.mrb[25].mxu0  ;;  %v1198_v29 = vmax.f32 %v851_v23, 0.0 }
 0x12e   :  { %v854_v26 = vpop.f32.mrb[26].mxu0  ;;  %v1134_v24 = vpop.f32.mrb[22].mxu1 }
 0x12f   :  { %v1199_v30 = vmax.f32 %v854_v26, 0.0  ;;  %v856_v31 = vpop.f32.mrb[27].mxu0  ;;  %v1269_v26 = vmax.f32 %v1134_v24, 0.0 }
 0x131   :  { %v1288_v34 = vpack.c.bf16 %v1199_v30, %v1198_v29  ;;  %1066 = vmatmul.mubr.bf16.gmra.mrb[132].mxu0 %v2687_v25  ;;  %v3163_v33 = vpack.c.bf16 %v1269_v26, %v1268_v21 }
 0x132   :  { %2285 = vmatprep.mubr.msk.bf16.mxu0 %vm624_vm0, %v2688_v27  ;;  %v1136_v27 = vpop.f32.mrb[23].mxu1 }
 0x133   :  { %2427 = vmatprep.mubr.msk.bf16.mxu1 %vm1366_vm2, %v1288_v34  ;;  %v1139_v29 = vpop.f32.mrb[24].mxu1 }
 0x134   :  { %v859_v42 = vpop.f32.mrb[28].mxu0  ;;  %v1141_v34 = vpop.f32.mrb[25].mxu1  ;;  %v1270_v37 = vmax.f32 %v1139_v29, 0.0 }
 0x135   :  { %v861_v44 = vpop.f32.mrb[29].mxu0  ;;  %v1200_v51 = vmax.f32 %v859_v42, 0.0  ;;  %v1142_v35 = vpop.f32.mrb[26].mxu1 }
 0x136   :  { %v862_v48 = vpop.f32.mrb[30].mxu0  ;;  %v1271_v38 = vmax.f32 %v1142_v35, 0.0  ;;  %v1144_v40 = vpop.f32.mrb[27].mxu1 }
 0x137   :  { %v1201_v52 = vmax.f32 %v862_v48, 0.0  ;;  %v864_v53 = vpop.f32.mrb[31].mxu0  ;;  %v1147_v41 = vpop.f32.mrb[28].mxu1 }
 0x138   :  { %v3166_v42 = vpack.c.bf16 %v1271_v38, %v1270_v37  ;;  %v1272_v43 = vmax.f32 %v1147_v41, 0.0  ;;  %v1149_v44 = vpop.f32.mrb[29].mxu1 }
 0x139   :  { %v1289_v57 = vpack.c.bf16 %v1201_v52, %v1200_v51  ;;  %1074 = vmatmul.mubr.bf16.gmra.mrb[136].mxu0 %v2690_v45  ;;  %v1150_v46 = vpop.f32.mrb[30].mxu1 }
 0x13a   :  { %2286 = vmatprep.mubr.msk.bf16.mxu0 %vm624_vm0, %v2691_v49  ;;  %v1273_v48 = vmax.f32 %v1150_v46, 0.0  ;;  %v1152_v49 = vpop.f32.mrb[31].mxu1 }
 0x13b   :  { %2428 = vmatmul.mubr.msk.bf16.gmra.mrb[60].mxu1 %vm1366_vm2, %v1289_v57 }
 0x13c   :  { %v867_v2 = vpop.f32.mrb[32].mxu0  ;;  %v1155_v51 = vpop.f32.mrb[32].mxu1  ;;  %v3168_v56 = vpack.c.bf16 %v1273_v48, %v1272_v43 }
 0x13d   :  { %v869_v4 = vpop.f32.mrb[33].mxu0  ;;  %v1202_v9 = vmax.f32 %v867_v2, 0.0  ;;  %v1157_v57 = vpop.f32.mrb[33].mxu1  ;;  %v1274_v60 = vmax.f32 %v1155_v51, 0.0 }
 0x13e   :  { %v870_v7 = vpop.f32.mrb[34].mxu0  ;;  %v1158_v58 = vpop.f32.mrb[34].mxu1 }
 0x13f   :  { %v1203_v10 = vmax.f32 %v870_v7, 0.0  ;;  %v872_v11 = vpop.f32.mrb[35].mxu0  ;;  %v1275_v61 = vmax.f32 %v1158_v58, 0.0  ;;  %v1160_v63 = vpop.f32.mrb[35].mxu1 }
 0x141   :  { %v1290_v15 = vpack.c.bf16 %v1203_v10, %v1202_v9  ;;  %1082 = vmatmul.mubr.bf16.gmra.mrb[140].mxu0 %v2693_v5  ;;  %v3171_v2 = vpack.c.bf16 %v1275_v61, %v1274_v60 }
 0x143   :  { %2431 = vmatprep.mubr.msk.bf16.mxu1 %vm1366_vm2, %v1290_v15 }
 0x144   :  { %v875_v23 = vpop.f32.mrb[36].mxu0  ;;  %v1163_v0 = vpop.f32.mrb[36].mxu1 }
 0x145   :  { %v877_v25 = vpop.f32.mrb[37].mxu0  ;;  %v1204_v30 = vmax.f32 %v875_v23, 0.0  ;;  %v1276_v3 = vmax.f32 %v1163_v0, 0.0  ;;  %v1165_v4 = vpop.f32.mrb[37].mxu1 }
 0x146   :  { %v878_v28 = vpop.f32.mrb[38].mxu0  ;;  %v1166_v6 = vpop.f32.mrb[38].mxu1 }
 0x147   :  { %v1205_v31 = vmax.f32 %v878_v28, 0.0  ;;  %v880_v32 = vpop.f32.mrb[39].mxu0  ;;  %v1277_v7 = vmax.f32 %v1166_v6, 0.0  ;;  %v1168_v8 = vpop.f32.mrb[39].mxu1 }
 0x149   :  { %v1291_v36 = vpack.c.bf16 %v1205_v31, %v1204_v30  ;;  %v3173_v15 = vpack.c.bf16 %v1277_v7, %v1276_v3 }
 0x14b   :  { %2432 = vmatmul.mubr.msk.bf16.gmra.mrb[64].mxu1 %vm1366_vm2, %v1291_v36 }
 0x14c   :  { %v883_v45 = vpop.f32.mrb[40].mxu0  ;;  %v1171_v10 = vpop.f32.mrb[40].mxu1 }
 0x14d   :  { %v885_v47 = vpop.f32.mrb[41].mxu0  ;;  %v1206_v52 = vmax.f32 %v883_v45, 0.0  ;;  %v1173_v16 = vpop.f32.mrb[41].mxu1  ;;  %v1278_v19 = vmax.f32 %v1171_v10, 0.0 }
 0x14e   :  { %v886_v50 = vpop.f32.mrb[42].mxu0  ;;  %v1174_v17 = vpop.f32.mrb[42].mxu1 }
 0x14f   :  { %v1207_v53 = vmax.f32 %v886_v50, 0.0  ;;  %v888_v55 = vpop.f32.mrb[43].mxu0  ;;  %v1279_v21 = vmax.f32 %v1174_v17, 0.0  ;;  %v1176_v22 = vpop.f32.mrb[43].mxu1 }
 0x151   :  { %v1292_v59 = vpack.c.bf16 %v1207_v53, %v1206_v52  ;;  %v3176_v24 = vpack.c.bf16 %v1279_v21, %v1278_v19 }
 0x153   :  { %2435 = vmatprep.mubr.msk.bf16.mxu1 %vm1366_vm2, %v1292_v59 }
 0x154   :  { %v891_v5 = vpop.f32.mrb[44].mxu0  ;;  %v1179_v23 = vpop.f32.mrb[44].mxu1 }
 0x155   :  { %v893_v1 = vpop.f32.mrb[45].mxu0  ;;  %v1208_v11 = vmax.f32 %v891_v5, 0.0  ;;  %v1280_v25 = vmax.f32 %v1179_v23, 0.0  ;;  %v1181_v26 = vpop.f32.mrb[45].mxu1 }
 0x156   :  { %v894_v9 = vpop.f32.mrb[46].mxu0  ;;  %v1182_v28 = vpop.f32.mrb[46].mxu1 }
 0x157   :  { %v1209_v13 = vmax.f32 %v894_v9, 0.0  ;;  %v896_v14 = vpop.f32.mrb[47].mxu0  ;;  %v1281_v30 = vmax.f32 %v1182_v28, 0.0  ;;  %v1184_v31 = vpop.f32.mrb[47].mxu1 }
 0x159   :  { %v1293_v18 = vpack.c.bf16 %v1209_v13, %v1208_v11  ;;  %v3178_v37 = vpack.c.bf16 %v1281_v30, %v1280_v25 }
 0x15b   :  { %2436 = vmatmul.mubr.msk.bf16.gmra.mrb[68].mxu1 %vm1366_vm2, %v1293_v18 }
 0x15c   :  { %v899_v27 = vpop.f32.mrb[48].mxu0 }
 0x15d   :  { %v901_v29 = vpop.f32.mrb[49].mxu0  ;;  %v1210_v34 = vmax.f32 %v899_v27, 0.0 }
 0x15e   :  { %v902_v32 = vpop.f32.mrb[50].mxu0 }
 0x15f   :  { %v1211_v35 = vmax.f32 %v902_v32, 0.0  ;;  %v904_v36 = vpop.f32.mrb[51].mxu0 }
 0x161   :  { %v1294_v38 = vpack.c.bf16 %v1211_v35, %v1210_v34 }
 0x163   :  { %2439 = vmatprep.mubr.msk.bf16.mxu1 %vm1366_vm2, %v1294_v38 }
 0x164   :  { %v907_v40 = vpop.f32.mrb[52].mxu0 }
 0x165   :  { %v909_v41 = vpop.f32.mrb[53].mxu0  ;;  %v1212_v44 = vmax.f32 %v907_v40, 0.0 }
 0x166   :  { %v910_v43 = vpop.f32.mrb[54].mxu0 }
 0x167   :  { %v1213_v45 = vmax.f32 %v910_v43, 0.0  ;;  %v912_v46 = vpop.f32.mrb[55].mxu0 }
 0x169   :  { %v1295_v47 = vpack.c.bf16 %v1213_v45, %v1212_v44 }
 0x16b   :  { %2440 = vmatmul.mubr.msk.bf16.gmra.mrb[72].mxu1 %vm1366_vm2, %v1295_v47 }
 0x16c   :  { %v915_v48 = vpop.f32.mrb[56].mxu0 }
 0x16d   :  { %v917_v49 = vpop.f32.mrb[57].mxu0  ;;  %v1214_v51 = vmax.f32 %v915_v48, 0.0 }
 0x16e   :  { %v918_v50 = vpop.f32.mrb[58].mxu0 }
 0x16f   :  { %v1215_v52 = vmax.f32 %v918_v50, 0.0  ;;  %v920_v53 = vpop.f32.mrb[59].mxu0 }
 0x171   :  { %v1296_v55 = vpack.c.bf16 %v1215_v52, %v1214_v51 }
 0x173   :  { %2443 = vmatprep.mubr.msk.bf16.mxu1 %vm1366_vm2, %v1296_v55 }
 0x174   :  { %v923_v57 = vpop.f32.mrb[60].mxu0 }
 0x175   :  { %v925_v58 = vpop.f32.mrb[61].mxu0  ;;  %v1216_v60 = vmax.f32 %v923_v57, 0.0 }
 0x176   :  { %v926_v59 = vpop.f32.mrb[62].mxu0 }
 0x177   :  { %v1217_v61 = vmax.f32 %v926_v59, 0.0  ;;  %v928_v63 = vpop.f32.mrb[63].mxu0 }
 0x179   :  { %v1297_v0 = vpack.c.bf16 %v1217_v61, %v1216_v60 }
 0x17b   :  { %2444 = vmatmul.mubr.msk.bf16.gmra.mrb[76].mxu1 %vm1366_vm2, %v1297_v0 }
 0x17c   :  { %v931_v3 = vpop.f32.mrb[64].mxu0 }
 0x17d   :  { %v933_v4 = vpop.f32.mrb[65].mxu0  ;;  %v1218_v6 = vmax.f32 %v931_v3, 0.0 }
 0x17e   :  { %v934_v5 = vpop.f32.mrb[66].mxu0 }
 0x17f   :  { %v1219_v1 = vmax.f32 %v934_v5, 0.0  ;;  %v936_v7 = vpop.f32.mrb[67].mxu0 }
 0x181   :  { %v1298_v8 = vpack.c.bf16 %v1219_v1, %v1218_v6 }
 0x183   :  { %2447 = vmatprep.mubr.msk.bf16.mxu1 %vm1366_vm2, %v1298_v8 }
 0x184   :  { %v939_v9 = vpop.f32.mrb[68].mxu0 }
 0x185   :  { %v941_v10 = vpop.f32.mrb[69].mxu0  ;;  %v1220_v13 = vmax.f32 %v939_v9, 0.0 }
 0x186   :  { %v942_v11 = vpop.f32.mrb[70].mxu0 }
 0x187   :  { %v1221_v14 = vmax.f32 %v942_v11, 0.0  ;;  %v944_v16 = vpop.f32.mrb[71].mxu0 }
 0x189   :  { %v1299_v17 = vpack.c.bf16 %v1221_v14, %v1220_v13 }
 0x18b   :  { %2448 = vmatmul.mubr.msk.bf16.gmra.mrb[80].mxu1 %vm1366_vm2, %v1299_v17 }
 0x18c   :  { %v947_v18 = vpop.f32.mrb[72].mxu0 }
 0x18d   :  { %v949_v19 = vpop.f32.mrb[73].mxu0  ;;  %v1222_v22 = vmax.f32 %v947_v18, 0.0 }
 0x18e   :  { %v950_v21 = vpop.f32.mrb[74].mxu0 }
 0x18f   :  { %v1223_v23 = vmax.f32 %v950_v21, 0.0  ;;  %v952_v25 = vpop.f32.mrb[75].mxu0 }
 0x191   :  { %v1300_v26 = vpack.c.bf16 %v1223_v23, %v1222_v22 }
 0x193   :  { %2451 = vmatprep.mubr.msk.bf16.mxu1 %vm1366_vm2, %v1300_v26 }
 0x194   :  { %v955_v27 = vpop.f32.mrb[76].mxu0 }
 0x195   :  { %v957_v28 = vpop.f32.mrb[77].mxu0  ;;  %v1224_v30 = vmax.f32 %v955_v27, 0.0 }
 0x196   :  { %v958_v29 = vpop.f32.mrb[78].mxu0 }
 0x197   :  { %v1225_v31 = vmax.f32 %v958_v29, 0.0  ;;  %v960_v32 = vpop.f32.mrb[79].mxu0 }
 0x199   :  { %v1301_v34 = vpack.c.bf16 %v1225_v31, %v1224_v30 }
 0x19b   :  { %2452 = vmatmul.mubr.msk.bf16.gmra.mrb[84].mxu1 %vm1366_vm2, %v1301_v34 }
 0x19c   :  { %v963_v35 = vpop.f32.mrb[80].mxu0 }
 0x19d   :  { %v965_v36 = vpop.f32.mrb[81].mxu0  ;;  %v1226_v40 = vmax.f32 %v963_v35, 0.0 }
 0x19e   :  { %v966_v38 = vpop.f32.mrb[82].mxu0 }
 0x19f   :  { %v1227_v41 = vmax.f32 %v966_v38, 0.0  ;;  %v968_v43 = vpop.f32.mrb[83].mxu0 }
 0x1a1   :  { %v1302_v44 = vpack.c.bf16 %v1227_v41, %v1226_v40 }
 0x1a3   :  { %2455 = vmatprep.mubr.msk.bf16.mxu1 %vm1366_vm2, %v1302_v44 }
 0x1a4   :  { %v971_v45 = vpop.f32.mrb[84].mxu0 }
 0x1a5   :  { %v973_v46 = vpop.f32.mrb[85].mxu0  ;;  %v1228_v48 = vmax.f32 %v971_v45, 0.0 }
 0x1a6   :  { %v974_v47 = vpop.f32.mrb[86].mxu0 }
 0x1a7   :  { %v1229_v49 = vmax.f32 %v974_v47, 0.0  ;;  %v976_v50 = vpop.f32.mrb[87].mxu0 }
 0x1a9   :  { %v1303_v51 = vpack.c.bf16 %v1229_v49, %v1228_v48 }
 0x1ab   :  { %2456 = vmatmul.mubr.msk.bf16.gmra.mrb[88].mxu1 %vm1366_vm2, %v1303_v51 }
 0x1ac   :  { %v979_v52 = vpop.f32.mrb[88].mxu0 }
 0x1ad   :  { %v981_v53 = vpop.f32.mrb[89].mxu0  ;;  %v1230_v57 = vmax.f32 %v979_v52, 0.0 }
 0x1ae   :  { %v982_v55 = vpop.f32.mrb[90].mxu0 }
 0x1af   :  { %v1231_v58 = vmax.f32 %v982_v55, 0.0  ;;  %v984_v59 = vpop.f32.mrb[91].mxu0 }
 0x1b1   :  { %v1304_v60 = vpack.c.bf16 %v1231_v58, %v1230_v57 }
 0x1b3   :  { %2459 = vmatprep.mubr.msk.bf16.mxu1 %vm1366_vm2, %v1304_v60 }
 0x1b4   :  { %v987_v61 = vpop.f32.mrb[92].mxu0 }
 0x1b5   :  { %v989_v63 = vpop.f32.mrb[93].mxu0  ;;  %v1232_v3 = vmax.f32 %v987_v61, 0.0 }
 0x1b6   :  { %v990_v0 = vpop.f32.mrb[94].mxu0 }
 0x1b7   :  { %v1233_v4 = vmax.f32 %v990_v0, 0.0  ;;  %v992_v5 = vpop.f32.mrb[95].mxu0 }
 0x1b9   :  { %v1305_v6 = vpack.c.bf16 %v1233_v4, %v1232_v3 }
 0x1bb   :  { %2460 = vmatmul.mubr.msk.bf16.gmra.mrb[92].mxu1 %vm1366_vm2, %v1305_v6 }
 0x1bc   :  { %v995_v1 = vpop.f32.mrb[96].mxu0 }
 0x1bd   :  { %v997_v7 = vpop.f32.mrb[97].mxu0  ;;  %v1234_v9 = vmax.f32 %v995_v1, 0.0 }
 0x1be   :  { %v998_v8 = vpop.f32.mrb[98].mxu0 }
 0x1bf   :  { %v1235_v10 = vmax.f32 %v998_v8, 0.0  ;;  %v1000_v11 = vpop.f32.mrb[99].mxu0 }
 0x1c1   :  { %v1306_v13 = vpack.c.bf16 %v1235_v10, %v1234_v9 }
 0x1c3   :  { %2463 = vmatprep.mubr.msk.bf16.mxu1 %vm1366_vm2, %v1306_v13 }
 0x1c4   :  { %v1003_v14 = vpop.f32.mrb[100].mxu0 }
 0x1c5   :  { %v1005_v16 = vpop.f32.mrb[101].mxu0  ;;  %v1236_v18 = vmax.f32 %v1003_v14, 0.0 }
 0x1c6   :  { %v1006_v17 = vpop.f32.mrb[102].mxu0 }
 0x1c7   :  { %v1237_v19 = vmax.f32 %v1006_v17, 0.0  ;;  %v1008_v21 = vpop.f32.mrb[103].mxu0 }
 0x1c9   :  { %v1307_v22 = vpack.c.bf16 %v1237_v19, %v1236_v18 }
 0x1cb   :  { %2464 = vmatmul.mubr.msk.bf16.gmra.mrb[96].mxu1 %vm1366_vm2, %v1307_v22 }
 0x1cc   :  { %v1011_v23 = vpop.f32.mrb[104].mxu0 }
 0x1cd   :  { %v1013_v25 = vpop.f32.mrb[105].mxu0  ;;  %v1238_v27 = vmax.f32 %v1011_v23, 0.0 }
 0x1ce   :  { %v1014_v26 = vpop.f32.mrb[106].mxu0 }
 0x1cf   :  { %v1239_v28 = vmax.f32 %v1014_v26, 0.0  ;;  %v1016_v29 = vpop.f32.mrb[107].mxu0 }
 0x1d1   :  { %v1308_v30 = vpack.c.bf16 %v1239_v28, %v1238_v27 }
 0x1d3   :  { %2467 = vmatprep.mubr.msk.bf16.mxu1 %vm1366_vm2, %v1308_v30 }
 0x1d4   :  { %v1019_v31 = vpop.f32.mrb[108].mxu0 }
 0x1d5   :  { %v1021_v32 = vpop.f32.mrb[109].mxu0  ;;  %v1240_v35 = vmax.f32 %v1019_v31, 0.0 }
 0x1d6   :  { %v1022_v34 = vpop.f32.mrb[110].mxu0 }
 0x1d7   :  { %v1241_v36 = vmax.f32 %v1022_v34, 0.0  ;;  %v1024_v38 = vpop.f32.mrb[111].mxu0 }
 0x1d9   :  { %v1309_v40 = vpack.c.bf16 %v1241_v36, %v1240_v35 }
 0x1db   :  { %2468 = vmatmul.mubr.msk.bf16.gmra.mrb[100].mxu1 %vm1366_vm2, %v1309_v40 }
 0x1dc   :  { %v1027_v41 = vpop.f32.mrb[112].mxu0 }
 0x1dd   :  { %v1029_v43 = vpop.f32.mrb[113].mxu0  ;;  %v1242_v46 = vmax.f32 %v1027_v41, 0.0 }
 0x1de   :  { %v1030_v44 = vpop.f32.mrb[114].mxu0  ;;  %v3196_v45 = vpop.f32.mrb[48].mxu1 }
 0x1df   :  { %v1243_v47 = vmax.f32 %v1030_v44, 0.0  ;;  %v1032_v48 = vpop.f32.mrb[115].mxu0  ;;  %v3198_v49 = vpop.f32.mrb[49].mxu1 }
 0x1e0   :  { %v3200_v50 = vpop.f32.mrb[50].mxu1 }
 0x1e1   :  { %v1310_v51 = vpack.c.bf16 %v1243_v47, %v1242_v46  ;;  %v3202_v52 = vpop.f32.mrb[51].mxu1 }
 0x1e3   :  { %2471 = vmatprep.mubr.msk.bf16.mxu1 %vm1366_vm2, %v1310_v51 }
 0x1e4   :  { %v1035_v53 = vpop.f32.mrb[116].mxu0 }
 0x1e5   :  { %v1037_v55 = vpop.f32.mrb[117].mxu0  ;;  %v1244_v58 = vmax.f32 %v1035_v53, 0.0 }
 0x1e6   :  { %v1038_v57 = vpop.f32.mrb[118].mxu0 }
 0x1e7   :  { %v1245_v59 = vmax.f32 %v1038_v57, 0.0  ;;  %v1040_v60 = vpop.f32.mrb[119].mxu0 }
 0x1e9   :  { %v1311_v61 = vpack.c.bf16 %v1245_v59, %v1244_v58 }
 0x1eb   :  { %2472 = vmatmul.mubr.msk.bf16.gmra.mrb[104].mxu1 %vm1366_vm2, %v1311_v61 }
 0x1ec   :  { %v1043_v63 = vpop.f32.mrb[120].mxu0 }
 0x1ed   :  { %v1045_v0 = vpop.f32.mrb[121].mxu0  ;;  %v1246_v5 = vmax.f32 %v1043_v63, 0.0 }
 0x1ee   :  { %v1046_v3 = vpop.f32.mrb[122].mxu0  ;;  %v3206_v4 = vpop.f32.mrb[52].mxu1 }
 0x1ef   :  { %v1247_v6 = vmax.f32 %v1046_v3, 0.0  ;;  %v1048_v1 = vpop.f32.mrb[123].mxu0  ;;  %v3208_v7 = vpop.f32.mrb[53].mxu1 }
 0x1f0   :  { %v3210_v8 = vpop.f32.mrb[54].mxu1 }
 0x1f1   :  { %v1312_v9 = vpack.c.bf16 %v1247_v6, %v1246_v5  ;;  %v3212_v10 = vpop.f32.mrb[55].mxu1 }
 0x1f3   :  { %2475 = vmatprep.mubr.msk.bf16.mxu1 %vm1366_vm2, %v1312_v9 }
 0x1f4   :  { %v1051_v11 = vpop.f32.mrb[124].mxu0 }
 0x1f5   :  { %v1053_v13 = vpop.f32.mrb[125].mxu0  ;;  %v1248_v16 = vmax.f32 %v1051_v11, 0.0  ;;  %v1936_v11 = vmax.f32 %v3196_v45, 0.0 }
 0x1f6   :  { %v1054_v14 = vpop.f32.mrb[126].mxu0 }
 0x1f7   :  { %v1249_v17 = vmax.f32 %v1054_v14, 0.0  ;;  %v1056_v18 = vpop.f32.mrb[127].mxu0 }
 0x1f9   :  { %v1313_v19 = vpack.c.bf16 %v1249_v17, %v1248_v16  ;;  %v1934_v16 = vmax.f32 %v3198_v49, 0.0 }
 0x1fb   :  { %2476 = vmatmul.mubr.msk.bf16.gmra.mrb[108].mxu1 %vm1366_vm2, %v1313_v19  ;;  %v1937_v19 = vmax.f32 %v3200_v50, 0.0  ;;  %v1940_v50 = vmax.f32 %v3206_v4, 0.0 }
 0x1fc   :  { %v1059_v21 = vpop.f32.mrb[128].mxu0 }
 0x1fd   :  { %v1061_v22 = vpop.f32.mrb[129].mxu0  ;;  %v1250_v26 = vmax.f32 %v1059_v21, 0.0 }
 0x1fe   :  { %v1062_v23 = vpop.f32.mrb[130].mxu0  ;;  %v3216_v25 = vpop.f32.mrb[56].mxu1 }
 0x1ff   :  { %v1251_v27 = vmax.f32 %v1062_v23, 0.0  ;;  %v1064_v28 = vpop.f32.mrb[131].mxu0  ;;  %v3218_v29 = vpop.f32.mrb[57].mxu1 }
 0x200   :  { %v3220_v30 = vpop.f32.mrb[58].mxu1 }
 0x201   :  { %v1314_v31 = vpack.c.bf16 %v1251_v27, %v1250_v26  ;;  %v3222_v32 = vpop.f32.mrb[59].mxu1  ;;  %v1935_v26 = vmax.f32 %v3202_v52, 0.0 }
 0x203   :  { %2479 = vmatprep.mubr.msk.bf16.mxu1 %vm1366_vm2, %v1314_v31 }
 0x204   :  { %v1067_v34 = vpop.f32.mrb[132].mxu0 }
 0x205   :  { %v1069_v35 = vpop.f32.mrb[133].mxu0  ;;  %v1252_v38 = vmax.f32 %v1067_v34, 0.0  ;;  %v1938_v34 = vmax.f32 %v3208_v7, 0.0  ;;  %v1944_v7 = vmax.f32 %v3216_v25, 0.0 }
 0x206   :  { %v1070_v36 = vpop.f32.mrb[134].mxu0 }
 0x207   :  { %v1253_v40 = vmax.f32 %v1070_v36, 0.0  ;;  %v1072_v41 = vpop.f32.mrb[135].mxu0  ;;  %v1941_v36 = vmax.f32 %v3210_v8, 0.0 }
 0x208   :  { %v1939_v41 = vmax.f32 %v3212_v10, 0.0 }
 0x209   :  { %v1315_v43 = vpack.c.bf16 %v1253_v40, %v1252_v38 }
 0x20b   :  { %2480 = vmatmul.mubr.msk.bf16.gmra.mrb[112].mxu1 %vm1366_vm2, %v1315_v43 }
 0x20c   :  { %v1075_v44 = vpop.f32.mrb[136].mxu0 }
 0x20d   :  { %v1077_v46 = vpop.f32.mrb[137].mxu0  ;;  %v1254_v51 = vmax.f32 %v1075_v44, 0.0 }
 0x20e   :  { %v1078_v47 = vpop.f32.mrb[138].mxu0  ;;  %v3226_v48 = vpop.f32.mrb[60].mxu1  ;;  %v1942_v46 = vmax.f32 %v3218_v29, 0.0 }
 0x20f   :  { %v1255_v53 = vmax.f32 %v1078_v47, 0.0  ;;  %v1080_v55 = vpop.f32.mrb[139].mxu0  ;;  %v3228_v57 = vpop.f32.mrb[61].mxu1 }
 0x210   :  { %v3230_v58 = vpop.f32.mrb[62].mxu1 }
 0x211   :  { %v1316_v59 = vpack.c.bf16 %v1255_v53, %v1254_v51  ;;  %v3232_v60 = vpop.f32.mrb[63].mxu1 }
 0x213   :  { %2483 = vmatprep.mubr.msk.bf16.mxu1 %vm1366_vm2, %v1316_v59  ;;  %v1943_v59 = vmax.f32 %v3222_v32, 0.0 }
 0x214   :  { %v1083_v61 = vpop.f32.mrb[140].mxu0 }
 0x215   :  { %v1085_v63 = vpop.f32.mrb[141].mxu0  ;;  %v1256_v3 = vmax.f32 %v1083_v61, 0.0 }
 0x216   :  { %v1086_v0 = vpop.f32.mrb[142].mxu0 }
 0x217   :  { %v1257_v5 = vmax.f32 %v1086_v0, 0.0  ;;  %v1088_v6 = vpop.f32.mrb[143].mxu0 }
 0x219   :  { %v1317_v1 = vpack.c.bf16 %v1257_v5, %v1256_v3  ;;  %v1948_v3 = vmax.f32 %v3226_v48, 0.0 }
 0x21b   :  { %2484 = vmatmul.mubr.msk.bf16.gmra.mrb[116].mxu1 %vm1366_vm2, %v1317_v1 }
 0x21c   :  { %2487 = vmatprep.mubr.msk.bf16.mxu1 %vm1366_vm2, %v3141_v39 }
 0x21e   :  { %v2433_v9 = vpop.f32.mrb[64].mxu1 }
 0x21f   :  { %v1952_v13 = vmax.f32 %v2433_v9, 0.0  ;;  %v1615_v14 = vpop.f32.mrb[65].mxu1 }
 0x220   :  { %v1950_v17 = vmax.f32 %v1615_v14, 0.0  ;;  %v2434_v18 = vpop.f32.mrb[66].mxu1 }
 0x221   :  { %v3241_v21 = vmax.f32 %v1936_v11, %v1952_v13  ;;  %v1953_v22 = vmax.f32 %v2434_v18, 0.0  ;;  %v1618_v23 = vpop.f32.mrb[67].mxu1  ;;  %v1949_v11 = vmax.f32 %v3230_v58, 0.0 }
 0x222   :  { %v3244_v27 = vmax.f32 %v1934_v16, %v1950_v17  ;;  %v1951_v39 = vmax.f32 %v1618_v23, 0.0  ;;  %v1947_v16 = vmax.f32 %v3232_v60, 0.0 }
 0x223   :  { %v3246_v28 = vmax.f32 %v1937_v19, %v1953_v22  ;;  %2488 = vmatmul.mubr.msk.bf16.gmra.mrb[120].mxu1 %vm1366_vm2, %v3149_v54 }
 0x224   :  { %v3250_v45 = vmax.f32 %v1935_v26, %v1951_v39  ;;  %2491 = vmatprep.mubr.msk.bf16.mxu1 %vm1366_vm2, %v3153_v62 }
 0x22b   :  { %2492 = vmatmul.mubr.msk.bf16.gmra.mrb[124].mxu1 %vm1366_vm2, %v3158_v12 }
 0x22c   :  { %2495 = vmatprep.mubr.msk.bf16.mxu1 %vm1366_vm2, %v3161_v20 }
 0x22e   :  { %v2437_v49 = vpop.f32.mrb[68].mxu1 }
 0x22f   :  { %v1956_v52 = vmax.f32 %v2437_v49, 0.0  ;;  %v1631_v31 = vpop.f32.mrb[69].mxu1 }
 0x230   :  { %v1954_v35 = vmax.f32 %v1631_v31, 0.0  ;;  %v2438_v54 = vpop.f32.mrb[70].mxu1 }
 0x231   :  { %v2036_v38 = vmax.f32 %v1940_v50, %v1956_v52  ;;  %v1957_v40 = vmax.f32 %v2438_v54, 0.0  ;;  %v1634_v62 = vpop.f32.mrb[71].mxu1 }
 0x232   :  { %v2034_v12 = vmax.f32 %v1938_v34, %v1954_v35  ;;  %v1955_v43 = vmax.f32 %v1634_v62, 0.0 }
 0x233   :  { %v2037_v44 = vmax.f32 %v1941_v36, %v1957_v40  ;;  %2496 = vmatmul.mubr.msk.bf16.gmra.mrb[128].mxu1 %vm1366_vm2, %v3163_v33  ;;  %v1945_v33 = vmax.f32 %v3220_v30, 0.0 }
 0x234   :  { %v2035_v20 = vmax.f32 %v1939_v41, %v1955_v43  ;;  %2499 = vmatprep.mubr.msk.bf16.mxu1 %vm1366_vm2, %v3166_v42 }
 0x23b   :  { %2500 = vmatmul.mubr.msk.bf16.gmra.mrb[132].mxu1 %vm1366_vm2, %v3168_v56 }
 0x23c   :  { %2503 = vmatprep.mubr.msk.bf16.mxu1 %vm1366_vm2, %v3171_v2 }
 0x23e   :  { %v2441_v4 = vpop.f32.mrb[72].mxu1 }
 0x23f   :  { %v1960_v8 = vmax.f32 %v2441_v4, 0.0  ;;  %v1647_v10 = vpop.f32.mrb[73].mxu1 }
 0x240   :  { %v1958_v47 = vmax.f32 %v1647_v10, 0.0  ;;  %v2442_v51 = vpop.f32.mrb[74].mxu1 }
 0x241   :  { %v2040_v53 = vmax.f32 %v1944_v7, %v1960_v8  ;;  %v1961_v55 = vmax.f32 %v2442_v51, 0.0  ;;  %v1650_v42 = vpop.f32.mrb[75].mxu1 }
 0x242   :  { %v2038_v56 = vmax.f32 %v1942_v46, %v1958_v47  ;;  %v1959_v61 = vmax.f32 %v1650_v42, 0.0 }
 0x243   :  { %v2048_v2 = vmax.f32 %v3241_v21, %v2040_v53  ;;  %v2041_v63 = vmax.f32 %v1945_v33, %v1961_v55  ;;  %2504 = vmatmul.mubr.msk.bf16.gmra.mrb[136].mxu1 %vm1366_vm2, %v3173_v15  ;;  %v1946_v15 = vmax.f32 %v3228_v57, 0.0 }
 0x244   :  { %v2046_v25 = vmax.f32 %v3244_v27, %v2038_v56  ;;  %v2039_v29 = vmax.f32 %v1943_v59, %v1959_v61  ;;  %2507 = vmatprep.mubr.msk.bf16.mxu1 %vm1366_vm2, %v3176_v24 }
 0x245   :  { %v2049_v30 = vmax.f32 %v3246_v28, %v2041_v63 }
 0x246   :  { %v2047_v0 = vmax.f32 %v3250_v45, %v2039_v29 }
 0x24b   :  { %2508 = vmatmul.mubr.msk.bf16.gmra.mrb[140].mxu1 %vm1366_vm2, %v3178_v37 }
 0x24e   :  { %v2445_v32 = vpop.f32.mrb[76].mxu1 }
 0x24f   :  { %v1964_v5 = vmax.f32 %v2445_v32, 0.0  ;;  %v1663_v6 = vpop.f32.mrb[77].mxu1 }
 0x250   :  { %v1962_v1 = vmax.f32 %v1663_v6, 0.0  ;;  %v2446_v9 = vpop.f32.mrb[78].mxu1 }
 0x251   :  { %v2044_v13 = vmax.f32 %v1948_v3, %v1964_v5  ;;  %v1965_v24 = vmax.f32 %v2446_v9, 0.0  ;;  %v1666_v14 = vpop.f32.mrb[79].mxu1 }
 0x252   :  { %v2042_v17 = vmax.f32 %v1946_v15, %v1962_v1  ;;  %v1963_v18 = vmax.f32 %v1666_v14, 0.0 }
 0x253   :  { %v2052_v19 = vmax.f32 %v2036_v38, %v2044_v13  ;;  %v2045_v37 = vmax.f32 %v1949_v11, %v1965_v24 }
 0x254   :  { %v2050_v21 = vmax.f32 %v2034_v12, %v2042_v17  ;;  %v2043_v22 = vmax.f32 %v1947_v16, %v1963_v18 }
 0x255   :  { %v3288_v48 = vmax.f32 %v2048_v2, %v2052_v19  ;;  %v2053_v23 = vmax.f32 %v2037_v44, %v2045_v37 }
 0x256   :  { %v3290_v26 = vmax.f32 %v2046_v25, %v2050_v21  ;;  %v2051_v57 = vmax.f32 %v2035_v20, %v2043_v22 }
 0x257   :  { %v3292_v27 = vmax.f32 %v2049_v30, %v2053_v23 }
 0x258   :  { %v3294_v58 = vmax.f32 %v2047_v0, %v2051_v57 }
 0x25e   :  { %v3296_v39 = vpop.f32.mrb[80].mxu1 }
 0x25f   :  { %v1679_v28 = vpop.f32.mrb[81].mxu1 }
 0x260   :  { %v2450_v60 = vpop.f32.mrb[82].mxu1  ;;  %v1966_v52 = vmax.f32 %v1679_v28, 0.0 }
 0x261   :  { %v1682_v45 = vpop.f32.mrb[83].mxu1  ;;  %v1969_v35 = vmax.f32 %v2450_v60, 0.0 }
 0x262   :  { %v1967_v38 = vmax.f32 %v1682_v45, 0.0 }
 0x26e   :  { %v3298_v49 = vpop.f32.mrb[84].mxu1 }
 0x26f   :  { %v1695_v50 = vpop.f32.mrb[85].mxu1 }
 0x270   :  { %v1970_v31 = vmax.f32 %v1695_v50, 0.0  ;;  %v2454_v34 = vpop.f32.mrb[86].mxu1 }
 0x271   :  { %v1973_v54 = vmax.f32 %v2454_v34, 0.0  ;;  %v1698_v36 = vpop.f32.mrb[87].mxu1 }
 0x272   :  { %v2058_v40 = vmax.f32 %v1966_v52, %v1970_v31  ;;  %v1971_v62 = vmax.f32 %v1698_v36, 0.0 }
 0x273   :  { %v2061_v41 = vmax.f32 %v1969_v35, %v1973_v54 }
 0x274   :  { %v2059_v12 = vmax.f32 %v1967_v38, %v1971_v62 }
 0x27e   :  { %v3300_v43 = vpop.f32.mrb[88].mxu1 }
 0x27f   :  { %v1711_v44 = vpop.f32.mrb[89].mxu1 }
 0x280   :  { %v1974_v20 = vmax.f32 %v1711_v44, 0.0  ;;  %v2458_v4 = vpop.f32.mrb[90].mxu1 }
 0x281   :  { %v1977_v7 = vmax.f32 %v2458_v4, 0.0  ;;  %v1714_v8 = vpop.f32.mrb[91].mxu1 }
 0x282   :  { %v2062_v10 = vmax.f32 %v1974_v20, %v2058_v40  ;;  %v1975_v46 = vmax.f32 %v1714_v8, 0.0 }
 0x283   :  { %v2065_v47 = vmax.f32 %v1977_v7, %v2061_v41  ;;  %v1968_v7 = vmax.f32 %v3296_v39, 0.0 }
 0x284   :  { %v2063_v51 = vmax.f32 %v1975_v46, %v2059_v12 }
 0x28e   :  { %v3302_v33 = vpop.f32.mrb[92].mxu1 }
 0x28f   :  { %v1727_v53 = vpop.f32.mrb[93].mxu1 }
 0x290   :  { %v1978_v55 = vmax.f32 %v1727_v53, 0.0  ;;  %v2462_v42 = vpop.f32.mrb[94].mxu1 }
 0x291   :  { %v1981_v59 = vmax.f32 %v2462_v42, 0.0  ;;  %v1730_v56 = vpop.f32.mrb[95].mxu1 }
 0x292   :  { %v2066_v61 = vmax.f32 %v1978_v55, %v2062_v10  ;;  %v1979_v2 = vmax.f32 %v1730_v56, 0.0 }
 0x293   :  { %v2069_v63 = vmax.f32 %v1981_v59, %v2065_v47 }
 0x294   :  { %v2067_v25 = vmax.f32 %v1979_v2, %v2063_v51 }
 0x29e   :  { %v3304_v29 = vpop.f32.mrb[96].mxu1 }
 0x29f   :  { %v1743_v30 = vpop.f32.mrb[97].mxu1 }
 0x2a0   :  { %v1982_v0 = vmax.f32 %v1743_v30, 0.0  ;;  %v2466_v32 = vpop.f32.mrb[98].mxu1 }
 0x2a1   :  { %v1985_v3 = vmax.f32 %v2466_v32, 0.0  ;;  %v1746_v5 = vpop.f32.mrb[99].mxu1 }
 0x2a2   :  { %v2070_v6 = vmax.f32 %v1982_v0, %v2066_v61  ;;  %v1983_v15 = vmax.f32 %v1746_v5, 0.0 }
 0x2a3   :  { %v2073_v1 = vmax.f32 %v1985_v3, %v2069_v63  ;;  %v1972_v63 = vmax.f32 %v3298_v49, 0.0 }
 0x2a4   :  { %v2071_v9 = vmax.f32 %v1983_v15, %v2067_v25 }
 0x2ae   :  { %v3306_v11 = vpop.f32.mrb[100].mxu1 }
 0x2af   :  { %v1759_v13 = vpop.f32.mrb[101].mxu1 }
 0x2b0   :  { %v1986_v24 = vmax.f32 %v1759_v13, 0.0  ;;  %v2470_v14 = vpop.f32.mrb[102].mxu1 }
 0x2b1   :  { %v1989_v16 = vmax.f32 %v2470_v14, 0.0  ;;  %v1762_v17 = vpop.f32.mrb[103].mxu1 }
 0x2b2   :  { %v2074_v18 = vmax.f32 %v1986_v24, %v2070_v6  ;;  %v1987_v19 = vmax.f32 %v1762_v17, 0.0  ;;  %v1976_v24 = vmax.f32 %v3300_v43, 0.0 }
 0x2b3   :  { %v2077_v37 = vmax.f32 %v1989_v16, %v2073_v1 }
 0x2b4   :  { %v2075_v21 = vmax.f32 %v1987_v19, %v2071_v9 }
 0x2be   :  { %v3308_v22 = vpop.f32.mrb[104].mxu1 }
 0x2bf   :  { %v1775_v23 = vpop.f32.mrb[105].mxu1 }
 0x2c0   :  { %v1990_v57 = vmax.f32 %v1775_v23, 0.0  ;;  %v2474_v28 = vpop.f32.mrb[106].mxu1 }
 0x2c1   :  { %v1993_v60 = vmax.f32 %v2474_v28, 0.0  ;;  %v1778_v45 = vpop.f32.mrb[107].mxu1 }
 0x2c2   :  { %v2090_v50 = vmax.f32 %v1990_v57, %v2074_v18  ;;  %v1991_v52 = vmax.f32 %v1778_v45, 0.0  ;;  %v1980_v45 = vmax.f32 %v3302_v33, 0.0 }
 0x2c3   :  { %v2093_v31 = vmax.f32 %v1993_v60, %v2077_v37 }
 0x2c4   :  { %v2091_v34 = vmax.f32 %v1991_v52, %v2075_v21 }
 0x2ce   :  { %v3310_v35 = vpop.f32.mrb[108].mxu1 }
 0x2cf   :  { %v1791_v54 = vpop.f32.mrb[109].mxu1 }
 0x2d0   :  { %v1994_v36 = vmax.f32 %v1791_v54, 0.0  ;;  %v2478_v38 = vpop.f32.mrb[110].mxu1 }
 0x2d1   :  { %v1997_v40 = vmax.f32 %v2478_v38, 0.0  ;;  %v1794_v62 = vpop.f32.mrb[111].mxu1 }
 0x2d2   :  { %v2078_v41 = vmax.f32 %v1994_v36, %v2090_v50  ;;  %v1995_v12 = vmax.f32 %v1794_v62, 0.0 }
 0x2d3   :  { %v2081_v44 = vmax.f32 %v1997_v40, %v2093_v31 }
 0x2d4   :  { %v2079_v20 = vmax.f32 %v1995_v12, %v2091_v34 }
 0x2de   :  { %v2481_v4 = vpop.f32.mrb[112].mxu1 }
 0x2df   :  { %v2000_v8 = vmax.f32 %v2481_v4, 0.0  ;;  %v1807_v10 = vpop.f32.mrb[113].mxu1 }
 0x2e0   :  { %v1998_v46 = vmax.f32 %v1807_v10, 0.0  ;;  %v2482_v47 = vpop.f32.mrb[114].mxu1 }
 0x2e1   :  { %v3313_v51 = vmax.f32 %v1968_v7, %v2000_v8  ;;  %v2001_v53 = vmax.f32 %v2482_v47, 0.0  ;;  %v1810_v55 = vpop.f32.mrb[115].mxu1 }
 0x2e2   :  { %v2094_v42 = vmax.f32 %v1998_v46, %v2078_v41  ;;  %v1999_v59 = vmax.f32 %v1810_v55, 0.0 }
 0x2e3   :  { %v2097_v56 = vmax.f32 %v2001_v53, %v2081_v44  ;;  %v1984_v44 = vmax.f32 %v3304_v29, 0.0 }
 0x2e4   :  { %v2095_v61 = vmax.f32 %v1999_v59, %v2079_v20 }
 0x2ee   :  { %v2485_v2 = vpop.f32.mrb[116].mxu1 }
 0x2ef   :  { %v2004_v25 = vmax.f32 %v2485_v2, 0.0  ;;  %v1823_v30 = vpop.f32.mrb[117].mxu1 }
 0x2f0   :  { %v2002_v0 = vmax.f32 %v1823_v30, 0.0  ;;  %v2486_v32 = vpop.f32.mrb[118].mxu1 }
 0x2f1   :  { %v3316_v39 = vmax.f32 %v1972_v63, %v2004_v25  ;;  %v2005_v3 = vmax.f32 %v2486_v32, 0.0  ;;  %v1826_v5 = vpop.f32.mrb[119].mxu1 }
 0x2f2   :  { %v2082_v6 = vmax.f32 %v2002_v0, %v2094_v42  ;;  %v2003_v15 = vmax.f32 %v1826_v5, 0.0 }
 0x2f3   :  { %v2085_v1 = vmax.f32 %v2005_v3, %v2097_v56 }
 0x2f4   :  { %v2083_v9 = vmax.f32 %v2003_v15, %v2095_v61  ;;  %v1988_v61 = vmax.f32 %v3306_v11, 0.0 }
 0x2f6   :  { %v2489_v13 = vpop.f32.mrb[120].mxu1 }
 0x2f7   :  { %v2008_v14 = vmax.f32 %v2489_v13, 0.0  ;;  %v1839_v16 = vpop.f32.mrb[121].mxu1 }
 0x2f8   :  { %v2006_v17 = vmax.f32 %v1839_v16, 0.0  ;;  %v2490_v18 = vpop.f32.mrb[122].mxu1 }
 0x2f9   :  { %v3319_v49 = vmax.f32 %v1976_v24, %v2008_v14  ;;  %v2009_v19 = vmax.f32 %v2490_v18, 0.0  ;;  %v1842_v37 = vpop.f32.mrb[123].mxu1 }
 0x2fa   :  { %v2098_v21 = vmax.f32 %v2006_v17, %v2082_v6  ;;  %v2007_v23 = vmax.f32 %v1842_v37, 0.0 }
 0x2fb   :  { %v2101_v57 = vmax.f32 %v2009_v19, %v2085_v1  ;;  %v2118_v19 = vlaneseq }
 0x2fc   :  { %v2099_v28 = vmax.f32 %v2007_v23, %v2083_v9 }
 0x2fe   :  { %v2493_v60 = vpop.f32.mrb[124].mxu1 }
 0x2ff   :  { %v2012_v50 = vmax.f32 %v2493_v60, 0.0  ;;  %v1855_v52 = vpop.f32.mrb[125].mxu1  ;;  %v2119_v60 = vand.u32 127, %v2118_v19 }
 0x300   :  { %v2010_v31 = vmax.f32 %v1855_v52, 0.0  ;;  %v2494_v34 = vpop.f32.mrb[126].mxu1 }
 0x301   :  { %v3322_v43 = vmax.f32 %v1980_v45, %v2012_v50  ;;  %v2013_v54 = vmax.f32 %v2494_v34, 0.0  ;;  %v1858_v36 = vpop.f32.mrb[127].mxu1  ;;  %v1996_v50 = vmax.f32 %v3310_v35, 0.0  ;;  %vm2120_vm3 = vcmp.lt.s32.totalorder %v2119_v60, 64 }
 0x302   :  { %v2106_v38 = vmax.f32 %v2010_v31, %v2098_v21  ;;  %v2011_v40 = vmax.f32 %v1858_v36, 0.0 }
 0x303   :  { %v2109_v62 = vmax.f32 %v2013_v54, %v2101_v57 }
 0x304   :  { %v2107_v41 = vmax.f32 %v2011_v40, %v2099_v28 }
 0x306   :  { %v2497_v12 = vpop.f32.mrb[128].mxu1 }
 0x307   :  { %v2016_v20 = vmax.f32 %v2497_v12, 0.0  ;;  %v1871_v4 = vpop.f32.mrb[129].mxu1 }
 0x308   :  { %v2014_v7 = vmax.f32 %v1871_v4, 0.0  ;;  %v2498_v8 = vpop.f32.mrb[130].mxu1 }
 0x309   :  { %v2076_v33 = vmax.f32 %v1984_v44, %v2016_v20  ;;  %v2017_v10 = vmax.f32 %v2498_v8, 0.0  ;;  %v1874_v46 = vpop.f32.mrb[131].mxu1 }
 0x30a   :  { %v2086_v47 = vmax.f32 %v2014_v7, %v2106_v38  ;;  %v2015_v53 = vmax.f32 %v1874_v46, 0.0 }
 0x30b   :  { %v2092_v55 = vmax.f32 %v3313_v51, %v2076_v33  ;;  %v2089_v42 = vmax.f32 %v2017_v10, %v2109_v62  ;;  %v1992_v51 = vmax.f32 %v3308_v22, 0.0 }
 0x30c   :  { %v2087_v59 = vmax.f32 %v2015_v53, %v2107_v41 }
 0x30e   :  { %v2501_v56 = vpop.f32.mrb[132].mxu1 }
 0x30f   :  { %v2020_v2 = vmax.f32 %v2501_v56, 0.0  ;;  %v1887_v63 = vpop.f32.mrb[133].mxu1 }
 0x310   :  { %v2018_v25 = vmax.f32 %v1887_v63, 0.0  ;;  %v2502_v29 = vpop.f32.mrb[134].mxu1 }
 0x311   :  { %v2080_v30 = vmax.f32 %v1988_v61, %v2020_v2  ;;  %v2021_v0 = vmax.f32 %v2502_v29, 0.0  ;;  %v1890_v32 = vpop.f32.mrb[135].mxu1 }
 0x312   :  { %v2102_v3 = vmax.f32 %v2018_v25, %v2086_v47  ;;  %v2019_v5 = vmax.f32 %v1890_v32, 0.0 }
 0x313   :  { %v2096_v6 = vmax.f32 %v3316_v39, %v2080_v30  ;;  %v2105_v15 = vmax.f32 %v2021_v0, %v2089_v42 }
 0x314   :  { %v2103_v1 = vmax.f32 %v2019_v5, %v2087_v59 }
 0x316   :  { %v2505_v9 = vpop.f32.mrb[136].mxu1 }
 0x317   :  { %v2024_v13 = vmax.f32 %v2505_v9, 0.0  ;;  %v1903_v24 = vpop.f32.mrb[137].mxu1 }
 0x318   :  { %v2022_v14 = vmax.f32 %v1903_v24, 0.0  ;;  %v2506_v11 = vpop.f32.mrb[138].mxu1 }
 0x319   :  { %v2084_v16 = vmax.f32 %v1992_v51, %v2024_v13  ;;  %v2025_v17 = vmax.f32 %v2506_v11, 0.0  ;;  %v1906_v18 = vpop.f32.mrb[139].mxu1 }
 0x31a   :  { %v2110_v37 = vmax.f32 %v2022_v14, %v2102_v3  ;;  %v2023_v21 = vmax.f32 %v1906_v18, 0.0 }
 0x31b   :  { %v2100_v23 = vmax.f32 %v3319_v49, %v2084_v16  ;;  %v2113_v57 = vmax.f32 %v2025_v17, %v2105_v15 }
 0x31c   :  { %v2111_v28 = vmax.f32 %v2023_v21, %v2103_v1 }
 0x31d   :  { %v2108_v39 = vmax.f32 %v2092_v55, %v2100_v23 }
 0x31e   :  { %v2509_v45 = vpop.f32.mrb[140].mxu1 }
 0x31f   :  { %v2028_v22 = vmax.f32 %v2509_v45, 0.0  ;;  %v1919_v52 = vpop.f32.mrb[141].mxu1 }
 0x320   :  { %v2026_v31 = vmax.f32 %v1919_v52, 0.0  ;;  %v2510_v34 = vpop.f32.mrb[142].mxu1 }
 0x321   :  { %v2088_v54 = vmax.f32 %v1996_v50, %v2028_v22  ;;  %v2029_v36 = vmax.f32 %v2510_v34, 0.0  ;;  %v1922_v38 = vpop.f32.mrb[143].mxu1 }
 0x322   :  { %v2114_v40 = vmax.f32 %v2026_v31, %v2110_v37  ;;  %v2027_v62 = vmax.f32 %v1922_v38, 0.0 }
 0x323   :  { %v2104_v41 = vmax.f32 %v3322_v43, %v2088_v54  ;;  %v2117_v49 = vmax.f32 %v2029_v36, %v2113_v57 }
 0x324   :  { %v2121_v12 = vsel %vm2120_vm3, %v3290_v26, %v2114_v40  ;;  %v2115_v44 = vmax.f32 %v2027_v62, %v2111_v28 }
 0x325   :  { %v2112_v35 = vmax.f32 %v2096_v6, %v2104_v41  ;;  %2125 = vst [vmem:[#allocation2] sm:$0xff] %v2121_v12  ;;  %v2124_v20 = vsel %vm2120_vm3, %v3292_v27, %v2117_v49 }
 0x326   :  { %2128 = vst [vmem:[#allocation2 + $0x18] sm:$0xff] %v2124_v20  ;;  %v2122_v4 = vsel %vm2120_vm3, %v3294_v58, %v2115_v44 }
 0x327   :  { %v2116_v7 = vmax.f32 %v2108_v39, %v2112_v35  ;;  %2126 = vst [vmem:[#allocation2 + $0x8] sm:$0xff] %v2122_v4 }
 0x329   :  { %v2123_v43 = vsel %vm2120_vm3, %v3288_v48, %v2116_v7 }
 0x32a   :  { %2127 = vst [vmem:[#allocation2 + $0x10] sm:$0xff] %v2123_v43 }
 0x32b   :  { %2705 = shalt.err (!%p2702_p4)
}
 0x32c   :  { %s2706_s11 = scalar_lea.hbm %s3355_s3, 512 }
 0x32d   :  { %p2707_p5 = scmp.ne.s32.totalorder %s3355_s3, %s2706_s11  ;;  %p2710_p6 = scmp.lt.u32.totalorder %s2706_s11, %s3355_s3 }
 0x32f   :  { %p2712_p7 = pnand %p2710_p6, %p2707_p5 }
 0x331   :  { %2715 = shalt.err (!%p2712_p7)
}
 0x332   :  { %s2720_s15 = smov 128   ;;  %s2721_s16 = smov 8  }
 0x333   :  { %2140 = dma.vmem_to_hbm [thread:$0]  %s2135_s7, 512, %s3355_s3, [#allocation3], %s2720_s15, %s2720_s15, %s2721_s16  }
 0x334   :  { %2716 = dma.done.wait [#allocation3], 512  }
 0x335   :  { %2717 = vsyncadd [#allocation3], 4294966784 }
 0x336   :  { %2144 = vsyncpa [#allocation3], 1 }

</bundles_post_ra>
